<compile_context>
chip_gen: v6e
topology: v6e:2x2x1
jax: 0.10.0
libtpu: 0.0.40
codegen_flags: <defaults>
</compile_context>

<pallas_src>
import functools

import numpy as np
import jax
import jax.numpy as jnp
from jax import lax
from jax.experimental import pallas as pl
from jax.experimental.pallas import tpu as pltpu


# ------------------------------------------------------------------ in-kernel PRNG
_GOLD = np.uint32(0x9E3779B1)
_MIX1 = np.uint32(0x85EBCA6B)
_MIX2 = np.uint32(0xC2B2AE35)


def _hash_u32(idx_i32, seed_i32, salt):
    """Counter-based hash: uint32 mix of (per-element index, per-sample seed, stream salt)."""
    x = idx_i32.astype(jnp.uint32) * _GOLD + (seed_i32.astype(jnp.uint32) ^ np.uint32(salt))
    x = (x ^ (x >> np.uint32(15))) * _MIX1
    x = (x ^ (x >> np.uint32(13))) * _MIX2
    return x ^ (x >> np.uint32(16))


def _hash_uniform(idx_i32, seed_i32, salt):
    """Uniform [0,1) f32 from the top 24 hash bits (exact int32->f32 convert path)."""
    bits = (_hash_u32(idx_i32, seed_i32, salt) >> np.uint32(8)).astype(jnp.int32)
    return bits.astype(jnp.float32) * np.float32(1.0 / (1 << 24))


def _hash_bits31(idx_i32, seed_i32, salt):
    """Non-negative int32 hash bits for integer-threshold comparisons (no float convert)."""
    return (_hash_u32(idx_i32, seed_i32, salt) >> np.uint32(1)).astype(jnp.int32)


def _approx_std_normal(idx_i32, seed_i32, salt_a, salt_b):
    # TODO(synk): 2-uniform (triangular) approximation of N(0,1); adequate here
    # (depth noise std=0.005, RGB noise is clipped to +-1 sigma in the reference).
    u = _hash_uniform(idx_i32, seed_i32, salt_a) + _hash_uniform(idx_i32, seed_i32, salt_b)
    return (u - 1.0) * np.float32(2.4494897)


# ------------------------------------------------------------------ helpers
def _gaussian_band_matrix(size, ksize, sigma):
    """Band matrix B so that (B @ x) is a 1D Gaussian blur with reflect padding."""
    r = ksize // 2
    xs = np.arange(ksize, dtype=np.float64) - r
    g = np.exp(-0.5 * (xs / sigma) ** 2)
    g = g / g.sum()
    B = np.zeros((size, size), dtype=np.float32)
    for i in range(size):
        for tap in range(ksize):
            j = i + tap - r
            if j < 0:
                j = -j
            elif j >= size:
                j = 2 * size - 2 - j
            j = min(max(j, 0), size - 1)
            B[i, j] += g[tap]
    return B


def _rgb_layout(h, w):
    """Lane-dense (rows, lanes) factorisation of H*W*3 with lanes a multiple of 128."""
    total = h * w * 3
    if total % 128 == 0:
        lanes = 128
        while total % (lanes * 2) == 0 and lanes < 2048:
            lanes *= 2
        return total // lanes, lanes
    # TODO(synk): W*3 not a multiple of 128 -> masked partial stores on the tail lanes.
    return h, w * 3


def _pick_tile_rows(rows, lanes, target_elems=1 << 18):
    if rows <= 8:
        return rows
    t = max(8, (target_elems // max(lanes, 1)) // 8 * 8)
    return min(rows, t)


# ------------------------------------------------------------------ kernel A: DepthHoles blur
def _blur_minmax_kernel(seed_ref, bh_ref, bwt_ref, blur_ref, rmin_ref, rmax_ref):
    # TODO(synk): on v5e a ksize-tap shift-and-add (pltpu.roll) blur would waste less MXU
    # work; dense bf16 band-matrix matmuls are kept because v6e/v7x are HBM-bound here.
    n = pl.program_id(0)
    h = bh_ref.shape[0]
    w = bwt_ref.shape[0]
    seed = seed_ref[n]

    row = lax.broadcasted_iota(jnp.int32, (h, w), 0)
    col = lax.broadcasted_iota(jnp.int32, (h, w), 1)
    noise = _hash_uniform(row * w + col, seed, 0x243F6A88)          # DepthHoles uniform field

    # bf16 MXU operands, f32 accumulate (f32 matmul is multi-pass on the MXU).
    y = jnp.dot(noise.astype(jnp.bfloat16), bwt_ref[...],
                preferred_element_type=jnp.float32)                  # blur along W
    z = jnp.dot(bh_ref[...], y.astype(jnp.bfloat16),
                preferred_element_type=jnp.float32)                  # blur along H

    blur_ref[0] = z.astype(jnp.bfloat16)                             # bf16 field (2 B/px)
    rmin_ref[0] = jnp.min(z, axis=0, keepdims=True)                  # per-sample partials
    rmax_ref[0] = jnp.max(z, axis=0, keepdims=True)


def depth_holes_blur_pallas(seeds, bh, bwt, n):
    h = bh.shape[0]
    w = bwt.shape[0]
    # Rough per-invocation VMEM need; stay >= default 32 MiB but <= v7x's 64 MiB physical.
    est = 4 * (h * h + w * w) + 24 * h * w
    vmem_limit = int(min(64 * 2**20, max(32 * 2**20, 2 * est)))
    out_shapes = (jax.ShapeDtypeStruct((n, h, w), jnp.bfloat16),
                  jax.ShapeDtypeStruct((n, 1, w), jnp.float32),
                  jax.ShapeDtypeStruct((n, 1, w), jnp.float32))
    return pl.pallas_call(
        _blur_minmax_kernel,
        out_shape=out_shapes,
        grid=(n,),
        in_specs=[pl.BlockSpec(memory_space=pltpu.MemorySpace.SMEM),
                  pl.BlockSpec((h, h), lambda i: (0, 0)),
                  pl.BlockSpec((w, w), lambda i: (0, 0))],
        out_specs=(pl.BlockSpec((1, h, w), lambda i: (i, 0, 0)),
                   pl.BlockSpec((1, 1, w), lambda i: (i, 0, 0)),
                   pl.BlockSpec((1, 1, w), lambda i: (i, 0, 0))),
        compiler_params=pltpu.CompilerParams(
            dimension_semantics=("parallel",),
            vmem_limit_bytes=vmem_limit),
    )(seeds, bh, bwt)


# ------------------------------------------------------------------ kernel B: depth/pointmap/valid
_NPAR = 15  # per sample: [M = R @ K^-1 row-major (9), t (3), noise_scale, eff_thresh, keep]


def _depth_point_valid_kernel(params_ref, seed_ref, depth_ref, blur_ref, valid_ref,
                              depth_out_ref, pm_ref, valid_out_ref):
    n = pl.program_id(0)
    hb = pl.program_id(1)
    th = depth_ref.shape[1]
    w = depth_ref.shape[2]
    p = n * _NPAR
    seed = seed_ref[n]

    u = lax.broadcasted_iota(jnp.int32, (th, w), 1)
    vrow = lax.broadcasted_iota(jnp.int32, (th, w), 0) + hb * th
    pix = vrow * w + u                                               # global flat pixel id

    # DepthNoise, generated in-kernel (no (N,H,W) f32 noise stream from HBM).
    g = _approx_std_normal(pix, seed, 0x13198A2E, 0x03707344)
    d = depth_ref[0] + g * params_ref[p + 12]                        # noise_scale = apply*std
    depth_out_ref[0] = d

    # compute_pointmaps: X_world = d * (R @ K^-1 @ [u, v, 1]) + t
    uf = u.astype(jnp.float32)
    vf = vrow.astype(jnp.float32)
    rx = params_ref[p + 0] * uf + params_ref[p + 1] * vf + params_ref[p + 2]
    ry = params_ref[p + 3] * uf + params_ref[p + 4] * vf + params_ref[p + 5]
    rz = params_ref[p + 6] * uf + params_ref[p + 7] * vf + params_ref[p + 8]
    pm_ref[0, 0] = d * rx + params_ref[p + 9]
    pm_ref[0, 1] = d * ry + params_ref[p + 10]
    pm_ref[0, 2] = d * rz + params_ref[p + 11]

    # DepthHoles: (blur - mn)/(mx - mn) > thresh  <=>  blur > eff_thresh (precomputed)
    hole = jnp.logical_and(blur_ref[0].astype(jnp.float32) > params_ref[p + 13],
                           params_ref[p + 14] > 0.5)
    v_in = valid_ref[0].astype(jnp.int32)
    valid_out_ref[0] = jnp.where(hole, 0, v_in).astype(jnp.uint8)    # valid[mask] = False


def depth_point_valid_pallas(params, seeds, depths3, blurred, valid_u8, *, tile_h):
    n, h, w = depths3.shape
    grid = (n, pl.cdiv(h, tile_h))
    dmap = lambda i, j: (i, j, 0)
    pmap = lambda i, j: (i, 0, j, 0)
    out_shapes = (jax.ShapeDtypeStruct((n, h, w), jnp.float32),
                  jax.ShapeDtypeStruct((n, 3, h, w), jnp.float32),
                  jax.ShapeDtypeStruct((n, h, w), jnp.uint8))
    return pl.pallas_call(
        _depth_point_valid_kernel,
        out_shape=out_shapes,
        grid=grid,
        in_specs=[pl.BlockSpec(memory_space=pltpu.MemorySpace.SMEM),
                  pl.BlockSpec(memory_space=pltpu.MemorySpace.SMEM),
                  pl.BlockSpec((1, tile_h, w), dmap),
                  pl.BlockSpec((1, tile_h, w), dmap),
                  pl.BlockSpec((1, tile_h, w), dmap)],
        out_specs=(pl.BlockSpec((1, tile_h, w), dmap),
                   pl.BlockSpec((1, 3, tile_h, w), pmap),
                   pl.BlockSpec((1, tile_h, w), dmap)),
        input_output_aliases={2: 0, 4: 2},   # depth and valid mask updated in place
        compiler_params=pltpu.CompilerParams(
            dimension_semantics=("parallel", "parallel")),
    )(params, seeds, depths3, blurred, valid_u8)


# ------------------------------------------------------------------ kernel C: fused RGB ops
def _rgb_aug_kernel(params_ref, seed_ref, rgb_ref, out_ref, *, ratio, max_noise):
    # params (SMEM, flat N*4): [bright_mult, gamma, sp_flag, gn_flag] per sample.
    # TODO(synk): bf16 elementwise path is a ~2x VALU lever on v6e/v7x (not v5e); kept f32.
    n = pl.program_id(0)
    j = pl.program_id(1)
    tr = rgb_ref.shape[1]
    lanes = rgb_ref.shape[2]
    p = n * 4
    bright = params_ref[p + 0]
    gamma = params_ref[p + 1]
    sp_on = params_ref[p + 2] > 0.5
    gn_on = params_ref[p + 3] > 0.5
    seed = seed_ref[n]

    row = lax.broadcasted_iota(jnp.int32, (tr, lanes), 0) + j * tr
    col = lax.broadcasted_iota(jnp.int32, (tr, lanes), 1)
    idx = row * lanes + col                                          # flat (pixel*channel) id

    x = rgb_ref[0].astype(jnp.int32).astype(jnp.float32)             # [0, 255]

    # ChangeBright
    # TODO(synk): iaa.MultiplyBrightness scales the HSV V channel; approximated as a
    # per-sample multiply on raw RGB.
    x = jnp.clip(jnp.round(x * bright), 0.0, 255.0)

    # SaltAndPepper — gated per sample (skips PRNG work when off); raw 31-bit hash vs
    # integer thresholds, per-channel mask (half pepper, half salt).
    pep_thr = np.int32(int(ratio * 0.5 * 2147483648.0))
    salt_thr = np.int32(int((1.0 - ratio * 0.5) * 2147483648.0))

    def _sp(xv):
        bits = _hash_bits31(idx, seed, 0xA4093822)
        xv = jnp.where(bits < pep_thr, 0.0, xv)
        return jnp.where(bits > salt_thr, 255.0, xv)

    x = lax.cond(sp_on, _sp, lambda xv: xv, x)

    # ChangeContrast (GammaContrast): out = 255 * (in/255) ** gamma — gated per sample.
    def _gc(xv):
        xn = jnp.maximum(xv * np.float32(1.0 / 255.0), 1e-12)
        xg = jnp.exp(gamma * jnp.log(xn))
        xg = jnp.where(xv > 0.0, xg, 0.0)
        return jnp.clip(jnp.round(xg * 255.0), 0.0, 255.0)

    x = lax.cond(gamma != 1.0, _gc, lambda xv: xv, x)

    # RGBGaussianNoise — gated per sample; clipped approx-Gaussian noise, add, clip.
    def _gn(xv):
        nse = _approx_std_normal(idx, seed, 0x299F31D0, 0x082EFA98) * np.float32(max_noise)
        nse = jnp.clip(nse, -max_noise, max_noise)
        return jnp.clip(xv + nse, 0.0, 255.0)

    x = lax.cond(gn_on, _gn, lambda xv: xv, x)

    out_ref[0] = jnp.floor(x).astype(jnp.int32).astype(jnp.uint8)    # uint8 truncation


def rgb_aug_pallas(rgb3, rgb_params, seeds, *, ratio, max_noise, tile_r):
    n, rows, lanes = rgb3.shape
    grid = (n, pl.cdiv(rows, tile_r))
    imap = lambda i, j: (i, j, 0)
    kern = functools.partial(_rgb_aug_kernel, ratio=ratio, max_noise=max_noise)
    return pl.pallas_call(
        kern,
        out_shape=jax.ShapeDtypeStruct((n, rows, lanes), jnp.uint8),
        grid=grid,
        in_specs=[pl.BlockSpec(memory_space=pltpu.MemorySpace.SMEM),
                  pl.BlockSpec(memory_space=pltpu.MemorySpace.SMEM),
                  pl.BlockSpec((1, tile_r, lanes), imap)],
        out_specs=pl.BlockSpec((1, tile_r, lanes), imap),
        compiler_params=pltpu.CompilerParams(
            dimension_semantics=("parallel", "parallel")),
    )(rgb_params, seeds, rgb3)


# ------------------------------------------------------------------ forward
def augmentor_forward(batch, key,
                      depth_hole_prob=0.5, thresh_lower=0.6, thresh_upper=0.9,
                      ks_lower=3, ks_upper=27, sigma_lower=1.0, sigma_upper=7.0,
                      depth_noise_std=0.005, depth_noise_prob=1.0,
                      bright_prob=0.5, bright_mag=(0.5, 2.0),
                      sp_prob=0.3, sp_ratio=0.1,
                      contrast_prob=0.5, contrast_mag=(0.5, 2.0),
                      gnoise_prob=0.5, gnoise_max=10.0):
    cams = dict(batch['input_cams'])
    depths, valid, imgs = cams['depths'], cams['valid_masks'], cams['imgs']
    Ks, c2ws = cams['Ks'], cams['c2ws']
    N, _, H, W = depths.shape

    keys = jax.random.split(key, 10)
    # TODO(synk): ksize/sigma/bright/gamma are drawn at trace time (baked per compile),
    # matching the one-draw-per-batch construction of the iaa augmenters.
    nprng = np.random.RandomState(0)
    imax = jnp.iinfo(jnp.int32).max

    # ---- DepthHoles: blur an in-kernel uniform field, per-sample min/max partials ----
    ksize = int(nprng.choice(np.arange(ks_lower, ks_upper + 1, 2)))
    sigma = float(nprng.uniform(sigma_lower, sigma_upper))
    bh = jnp.asarray(_gaussian_band_matrix(H, ksize, sigma), dtype=jnp.bfloat16)
    bwt = jnp.asarray(_gaussian_band_matrix(W, ksize, sigma).T, dtype=jnp.bfloat16)
    blur_seeds = jax.random.randint(keys[0], (N,), 0, imax, dtype=jnp.int32)
    blurred, rmin, rmax = depth_holes_blur_pallas(blur_seeds, bh, bwt, N)
    mn = jnp.min(rmin)    # global min/max over the batch (matches noise.min()/.max())
    mx = jnp.max(rmax)

    thresh = (jax.random.uniform(keys[1], (N,), jnp.float32)
              * (thresh_upper - thresh_lower) + thresh_lower)
    keep = (jax.random.uniform(keys[2], (N,)) < depth_hole_prob).astype(jnp.float32)
    # (blur - mn)/(mx - mn) > thresh   <=>   blur > thresh*(mx - mn) + mn
    eff_thresh = thresh * (mx - mn) + mn

    # ---- DepthNoise + compute_pointmaps + valid-mask update (fused kernel B) ----
    dn_apply = (jax.random.uniform(keys[3], (N,)) < depth_noise_prob).astype(jnp.float32)
    Kinv = jnp.linalg.inv(Ks.astype(jnp.float32))
    R = c2ws[:, :3, :3].astype(jnp.float32)
    t = c2ws[:, :3, 3].astype(jnp.float32)
    M = jnp.einsum('nij,njk->nik', R, Kinv)
    params = jnp.concatenate(
        [M.reshape(N, 9), t, (dn_apply * depth_noise_std)[:, None],
         eff_thresh[:, None], keep[:, None]], axis=1).astype(jnp.float32).reshape(-1)

    depth_seeds = jax.random.randint(keys[4], (N,), 0, imax, dtype=jnp.int32)
    depths3 = depths.reshape(N, H, W).astype(jnp.float32)
    valid_u8 = valid.reshape(N, H, W).astype(jnp.uint8)
    tile_h = H if H <= 512 else 512
    depth_out3, pointmaps, valid_out_u8 = depth_point_valid_pallas(
        params, depth_seeds, depths3, blurred, valid_u8, tile_h=tile_h)

    # ---- RGB operators (ChangeBright -> SaltAndPepper -> ChangeContrast -> GaussNoise)
    bright_mult = float(nprng.uniform(*bright_mag))
    gamma = float(nprng.uniform(*contrast_mag))
    bright_on = jax.random.uniform(keys[5], (N,)) < bright_prob
    sp_on = jax.random.uniform(keys[6], (N,)) < sp_prob
    gamma_on = jax.random.uniform(keys[7], (N,)) < contrast_prob
    gn_on = jax.random.uniform(keys[8], (N,)) < gnoise_prob
    rgb_params = jnp.stack(
        [jnp.where(bright_on, bright_mult, 1.0),
         jnp.where(gamma_on, gamma, 1.0),
         sp_on.astype(jnp.float32),
         gn_on.astype(jnp.float32)], axis=1).astype(jnp.float32).reshape(-1)
    rgb_seeds = jax.random.randint(keys[9], (N,), 0, imax, dtype=jnp.int32)

    rows, lanes = _rgb_layout(H, W)                    # lane-dense uint8 slab
    tile_r = _pick_tile_rows(rows, lanes)
    rgb3 = imgs.reshape(N, rows, lanes)                # uint8 in, uint8 out
    rgb_out = rgb_aug_pallas(rgb3, rgb_params, rgb_seeds,
                             ratio=sp_ratio, max_noise=gnoise_max, tile_r=tile_r)

    cams['valid_masks'] = valid_out_u8.astype(jnp.bool_).reshape(N, 1, H, W)
    cams['depths'] = depth_out3.reshape(N, 1, H, W)
    cams['imgs'] = rgb_out.reshape(N, 1, H, W, 3)
    cams['pointmaps'] = pointmaps
    new_batch = dict(batch)
    new_batch['input_cams'] = cams
    return new_batch


# ------------------------------------------------------------------ main
if __name__ == "__main__":
    N, H, W = 2, 16, 16
    key = jax.random.PRNGKey(0)
    k1, k2, k3, k4 = jax.random.split(key, 4)

    depths = jax.random.uniform(k1, (N, 1, H, W), jnp.float32, 0.5, 3.0)
    valid = jnp.ones((N, 1, H, W), dtype=jnp.bool_)
    imgs = jax.random.randint(k2, (N, 1, H, W, 3), 0, 256, jnp.int32).astype(jnp.uint8)
    fx = fy = 20.0
    Ks = jnp.tile(jnp.array([[fx, 0.0, W / 2.0],
                             [0.0, fy, H / 2.0],
                             [0.0, 0.0, 1.0]], jnp.float32), (N, 1, 1))
    c2ws = jnp.tile(jnp.eye(4, dtype=jnp.float32), (N, 1, 1))
    c2ws = c2ws.at[:, :3, 3].set(jax.random.normal(k3, (N, 3)) * 0.1)

    batch = {'input_cams': {'depths': depths, 'valid_masks': valid, 'imgs': imgs,
                            'Ks': Ks, 'c2ws': c2ws}}

    fwd = jax.jit(augmentor_forward)
    out = fwd(batch, k4)
    jax.block_until_ready(out['input_cams']['pointmaps'])
    jax.block_until_ready(out['input_cams']['imgs'])
    jax.block_until_ready(out['input_cams']['depths'])
    jax.block_until_ready(out['input_cams']['valid_masks'])
    print("KERNEL_OK")
</pallas_src>

<mosaic_0001>
module attributes {stable_mosaic.version = 11 : i64} {
  func.func @_rgb_aug_kernel(%arg0: i32, %arg1: i32, %arg2: memref<8xf32, #tpu.memory_space<smem>>, %arg3: memref<2xi32, #tpu.memory_space<smem>>, %arg4: memref<1x3x256xi8, #tpu.memory_space<vmem>>, %arg5: memref<1x3x256xi8, #tpu.memory_space<vmem>>) attributes {dimension_semantics = [#tpu.dimension_semantics<parallel>, #tpu.dimension_semantics<parallel>], iteration_bounds = array<i64: 2, 1>, scalar_prefetch = 0 : i64, scratch_operands = 0 : i64, tpu.core_type = #tpu.core_type<tc>, window_params = [{transform_indices = @transform_0, window_bounds = array<i64: 8>}, {transform_indices = @transform_1, window_bounds = array<i64: 2>}, {transform_indices = @transform_2, window_bounds = array<i64: 1, 3, 256>}, {transform_indices = @transform_3, window_bounds = array<i64: 1, 3, 256>}]} {
    %c4_i32 = arith.constant 4 : i32
    %0 = arith.muli %arg0, %c4_i32 : i32
    %c0_i32 = arith.constant 0 : i32
    %1 = arith.addi %0, %c0_i32 : i32
    %2 = arith.index_cast %1 : i32 to index
    %3 = memref.load %arg2[%2] : memref<8xf32, #tpu.memory_space<smem>>
    %c1_i32 = arith.constant 1 : i32
    %4 = arith.addi %0, %c1_i32 : i32
    %5 = arith.index_cast %4 : i32 to index
    %6 = memref.load %arg2[%5] : memref<8xf32, #tpu.memory_space<smem>>
    %c2_i32 = arith.constant 2 : i32
    %7 = arith.addi %0, %c2_i32 : i32
    %8 = arith.index_cast %7 : i32 to index
    %9 = memref.load %arg2[%8] : memref<8xf32, #tpu.memory_space<smem>>
    %cst = arith.constant 5.000000e-01 : f32
    %10 = arith.cmpf ogt, %9, %cst : f32
    %c3_i32 = arith.constant 3 : i32
    %11 = arith.addi %0, %c3_i32 : i32
    %12 = arith.index_cast %11 : i32 to index
    %13 = memref.load %arg2[%12] : memref<8xf32, #tpu.memory_space<smem>>
    %cst_0 = arith.constant 5.000000e-01 : f32
    %14 = arith.cmpf ogt, %13, %cst_0 : f32
    %15 = arith.index_cast %arg0 : i32 to index
    %16 = memref.load %arg3[%15] : memref<2xi32, #tpu.memory_space<smem>>
    %17 = tpu.iota {dimensions = array<i32: 0>} : vector<3x256xi32>
    %c3_i32_1 = arith.constant 3 : i32
    %18 = arith.muli %arg1, %c3_i32_1 : i32
    %19 = vector.broadcast %18 : i32 to vector<3x256xi32>
    %20 = arith.addi %17, %19 : vector<3x256xi32>
    %21 = tpu.iota {dimensions = array<i32: 1>} : vector<3x256xi32>
    %c256_i32 = arith.constant 256 : i32
    %22 = vector.broadcast %c256_i32 : i32 to vector<3x256xi32>
    %23 = arith.muli %20, %22 : vector<3x256xi32>
    %24 = arith.addi %23, %21 : vector<3x256xi32>
    %c0 = arith.constant 0 : index
    %c0_2 = arith.constant 0 : index
    %c0_3 = arith.constant 0 : index
    %25 = vector.load %arg4[%c0, %c0_2, %c0_3] : memref<1x3x256xi8, #tpu.memory_space<vmem>>, vector<1x3x256xi8>
    %26 = vector.shape_cast %25 : vector<1x3x256xi8> to vector<3x256xi8>
    %27 = arith.extui %26 : vector<3x256xi8> to vector<3x256xi32>
    %28 = arith.sitofp %27 : vector<3x256xi32> to vector<3x256xf32>
    %29 = vector.broadcast %3 : f32 to vector<3x256xf32>
    %30 = arith.mulf %28, %29 : vector<3x256xf32>
    %31 = math.roundeven %30 : vector<3x256xf32>
    %cst_4 = arith.constant 0.000000e+00 : f32
    %cst_5 = arith.constant 2.550000e+02 : f32
    %32 = vector.broadcast %cst_4 : f32 to vector<3x256xf32>
    %33 = arith.maximumf %32, %31 : vector<3x256xf32>
    %34 = vector.broadcast %cst_5 : f32 to vector<3x256xf32>
    %35 = arith.minimumf %34, %33 : vector<3x256xf32>
    %36 = arith.extui %10 : i1 to i32
    %c0_i32_6 = arith.constant 0 : i32
    %37 = arith.cmpi ne, %36, %c0_i32_6 : i32
    %38 = scf.if %37 -> (vector<3x256xf32>) {
      %c-1640531535_i32 = arith.constant -1640531535 : i32
      %52 = vector.broadcast %c-1640531535_i32 : i32 to vector<3x256xi32>
      %53 = arith.muli %24, %52 : vector<3x256xi32>
      %c-1542899678_i32 = arith.constant -1542899678 : i32
      %54 = arith.xori %16, %c-1542899678_i32 : i32
      %55 = vector.broadcast %54 : i32 to vector<3x256xi32>
      %56 = arith.addi %53, %55 : vector<3x256xi32>
      %c15_i32 = arith.constant 15 : i32
      %57 = vector.broadcast %c15_i32 : i32 to vector<3x256xi32>
      %58 = arith.shrui %56, %57 : vector<3x256xi32>
      %59 = arith.xori %56, %58 : vector<3x256xi32>
      %c-2048144789_i32 = arith.constant -2048144789 : i32
      %60 = vector.broadcast %c-2048144789_i32 : i32 to vector<3x256xi32>
      %61 = arith.muli %59, %60 : vector<3x256xi32>
      %c13_i32 = arith.constant 13 : i32
      %62 = vector.broadcast %c13_i32 : i32 to vector<3x256xi32>
      %63 = arith.shrui %61, %62 : vector<3x256xi32>
      %64 = arith.xori %61, %63 : vector<3x256xi32>
      %c-1028477387_i32 = arith.constant -1028477387 : i32
      %65 = vector.broadcast %c-1028477387_i32 : i32 to vector<3x256xi32>
      %66 = arith.muli %64, %65 : vector<3x256xi32>
      %c16_i32 = arith.constant 16 : i32
      %67 = vector.broadcast %c16_i32 : i32 to vector<3x256xi32>
      %68 = arith.shrui %66, %67 : vector<3x256xi32>
      %69 = arith.xori %66, %68 : vector<3x256xi32>
      %c1_i32_13 = arith.constant 1 : i32
      %70 = vector.broadcast %c1_i32_13 : i32 to vector<3x256xi32>
      %71 = arith.shrui %69, %70 : vector<3x256xi32>
      %c107374182_i32 = arith.constant 107374182 : i32
      %72 = vector.broadcast %c107374182_i32 : i32 to vector<3x256xi32>
      %73 = arith.cmpi slt, %71, %72 : vector<3x256xi32>
      %cst_14 = arith.constant 0.000000e+00 : f32
      %74 = vector.broadcast %cst_14 : f32 to vector<3x256xf32>
      %75 = arith.select %73, %74, %35 : vector<3x256xi1>, vector<3x256xf32>
      %c2040109465_i32 = arith.constant 2040109465 : i32
      %76 = vector.broadcast %c2040109465_i32 : i32 to vector<3x256xi32>
      %77 = arith.cmpi sgt, %71, %76 : vector<3x256xi32>
      %cst_15 = arith.constant 2.550000e+02 : f32
      %78 = vector.broadcast %cst_15 : f32 to vector<3x256xf32>
      %79 = arith.select %77, %78, %75 : vector<3x256xi1>, vector<3x256xf32>
      scf.yield %79 : vector<3x256xf32>
    } else {
      scf.yield %35 : vector<3x256xf32>
    }
    %cst_7 = arith.constant 1.000000e+00 : f32
    %39 = arith.cmpf one, %6, %cst_7 : f32
    %40 = arith.extui %39 : i1 to i32
    %c0_i32_8 = arith.constant 0 : i32
    %41 = arith.cmpi ne, %40, %c0_i32_8 : i32
    %42 = scf.if %41 -> (vector<3x256xf32>) {
      %cst_13 = arith.constant 0.00392156886 : f32
      %52 = vector.broadcast %cst_13 : f32 to vector<3x256xf32>
      %53 = arith.mulf %38, %52 : vector<3x256xf32>
      %cst_14 = arith.constant 9.99999996E-13 : f32
      %54 = vector.broadcast %cst_14 : f32 to vector<3x256xf32>
      %55 = arith.maximumf %53, %54 : vector<3x256xf32>
      %56 = math.log %55 : vector<3x256xf32>
      %57 = vector.broadcast %6 : f32 to vector<3x256xf32>
      %58 = arith.mulf %57, %56 : vector<3x256xf32>
      %59 = math.exp %58 : vector<3x256xf32>
      %cst_15 = arith.constant 0.000000e+00 : f32
      %60 = vector.broadcast %cst_15 : f32 to vector<3x256xf32>
      %61 = arith.cmpf ogt, %38, %60 : vector<3x256xf32>
      %cst_16 = arith.constant 0.000000e+00 : f32
      %62 = vector.broadcast %cst_16 : f32 to vector<3x256xf32>
      %63 = arith.select %61, %59, %62 : vector<3x256xi1>, vector<3x256xf32>
      %cst_17 = arith.constant 2.550000e+02 : f32
      %64 = vector.broadcast %cst_17 : f32 to vector<3x256xf32>
      %65 = arith.mulf %63, %64 : vector<3x256xf32>
      %66 = math.roundeven %65 : vector<3x256xf32>
      %cst_18 = arith.constant 0.000000e+00 : f32
      %cst_19 = arith.constant 2.550000e+02 : f32
      %67 = vector.broadcast %cst_18 : f32 to vector<3x256xf32>
      %68 = arith.maximumf %67, %66 : vector<3x256xf32>
      %69 = vector.broadcast %cst_19 : f32 to vector<3x256xf32>
      %70 = arith.minimumf %69, %68 : vector<3x256xf32>
      scf.yield %70 : vector<3x256xf32>
    } else {
      scf.yield %38 : vector<3x256xf32>
    }
    %43 = arith.extui %14 : i1 to i32
    %c0_i32_9 = arith.constant 0 : i32
    %44 = arith.cmpi ne, %43, %c0_i32_9 : i32
    %45 = scf.if %44 -> (vector<3x256xf32>) {
      %c-1640531535_i32 = arith.constant -1640531535 : i32
      %52 = vector.broadcast %c-1640531535_i32 : i32 to vector<3x256xi32>
      %53 = arith.muli %24, %52 : vector<3x256xi32>
      %c698298832_i32 = arith.constant 698298832 : i32
      %54 = arith.xori %16, %c698298832_i32 : i32
      %55 = vector.broadcast %54 : i32 to vector<3x256xi32>
      %56 = arith.addi %53, %55 : vector<3x256xi32>
      %c15_i32 = arith.constant 15 : i32
      %57 = vector.broadcast %c15_i32 : i32 to vector<3x256xi32>
      %58 = arith.shrui %56, %57 : vector<3x256xi32>
      %59 = arith.xori %56, %58 : vector<3x256xi32>
      %c-2048144789_i32 = arith.constant -2048144789 : i32
      %60 = vector.broadcast %c-2048144789_i32 : i32 to vector<3x256xi32>
      %61 = arith.muli %59, %60 : vector<3x256xi32>
      %c13_i32 = arith.constant 13 : i32
      %62 = vector.broadcast %c13_i32 : i32 to vector<3x256xi32>
      %63 = arith.shrui %61, %62 : vector<3x256xi32>
      %64 = arith.xori %61, %63 : vector<3x256xi32>
      %c-1028477387_i32 = arith.constant -1028477387 : i32
      %65 = vector.broadcast %c-1028477387_i32 : i32 to vector<3x256xi32>
      %66 = arith.muli %64, %65 : vector<3x256xi32>
      %c16_i32 = arith.constant 16 : i32
      %67 = vector.broadcast %c16_i32 : i32 to vector<3x256xi32>
      %68 = arith.shrui %66, %67 : vector<3x256xi32>
      %69 = arith.xori %66, %68 : vector<3x256xi32>
      %c8_i32 = arith.constant 8 : i32
      %70 = vector.broadcast %c8_i32 : i32 to vector<3x256xi32>
      %71 = arith.shrui %69, %70 : vector<3x256xi32>
      %72 = arith.sitofp %71 : vector<3x256xi32> to vector<3x256xf32>
      %cst_13 = arith.constant 5.96046448E-8 : f32
      %73 = vector.broadcast %cst_13 : f32 to vector<3x256xf32>
      %74 = arith.mulf %72, %73 : vector<3x256xf32>
      %c-1640531535_i32_14 = arith.constant -1640531535 : i32
      %75 = vector.broadcast %c-1640531535_i32_14 : i32 to vector<3x256xi32>
      %76 = arith.muli %24, %75 : vector<3x256xi32>
      %c137296536_i32 = arith.constant 137296536 : i32
      %77 = arith.xori %16, %c137296536_i32 : i32
      %78 = vector.broadcast %77 : i32 to vector<3x256xi32>
      %79 = arith.addi %76, %78 : vector<3x256xi32>
      %c15_i32_15 = arith.constant 15 : i32
      %80 = vector.broadcast %c15_i32_15 : i32 to vector<3x256xi32>
      %81 = arith.shrui %79, %80 : vector<3x256xi32>
      %82 = arith.xori %79, %81 : vector<3x256xi32>
      %c-2048144789_i32_16 = arith.constant -2048144789 : i32
      %83 = vector.broadcast %c-2048144789_i32_16 : i32 to vector<3x256xi32>
      %84 = arith.muli %82, %83 : vector<3x256xi32>
      %c13_i32_17 = arith.constant 13 : i32
      %85 = vector.broadcast %c13_i32_17 : i32 to vector<3x256xi32>
      %86 = arith.shrui %84, %85 : vector<3x256xi32>
      %87 = arith.xori %84, %86 : vector<3x256xi32>
      %c-1028477387_i32_18 = arith.constant -1028477387 : i32
      %88 = vector.broadcast %c-1028477387_i32_18 : i32 to vector<3x256xi32>
      %89 = arith.muli %87, %88 : vector<3x256xi32>
      %c16_i32_19 = arith.constant 16 : i32
      %90 = vector.broadcast %c16_i32_19 : i32 to vector<3x256xi32>
      %91 = arith.shrui %89, %90 : vector<3x256xi32>
      %92 = arith.xori %89, %91 : vector<3x256xi32>
      %c8_i32_20 = arith.constant 8 : i32
      %93 = vector.broadcast %c8_i32_20 : i32 to vector<3x256xi32>
      %94 = arith.shrui %92, %93 : vector<3x256xi32>
      %95 = arith.sitofp %94 : vector<3x256xi32> to vector<3x256xf32>
      %cst_21 = arith.constant 5.96046448E-8 : f32
      %96 = vector.broadcast %cst_21 : f32 to vector<3x256xf32>
      %97 = arith.mulf %95, %96 : vector<3x256xf32>
      %98 = arith.addf %74, %97 : vector<3x256xf32>
      %cst_22 = arith.constant 1.000000e+00 : f32
      %99 = vector.broadcast %cst_22 : f32 to vector<3x256xf32>
      %100 = arith.subf %98, %99 : vector<3x256xf32>
      %cst_23 = arith.constant 2.44948959 : f32
      %101 = vector.broadcast %cst_23 : f32 to vector<3x256xf32>
      %102 = arith.mulf %100, %101 : vector<3x256xf32>
      %cst_24 = arith.constant 1.000000e+01 : f32
      %103 = vector.broadcast %cst_24 : f32 to vector<3x256xf32>
      %104 = arith.mulf %102, %103 : vector<3x256xf32>
      %cst_25 = arith.constant -1.000000e+01 : f32
      %cst_26 = arith.constant 1.000000e+01 : f32
      %105 = vector.broadcast %cst_25 : f32 to vector<3x256xf32>
      %106 = arith.maximumf %105, %104 : vector<3x256xf32>
      %107 = vector.broadcast %cst_26 : f32 to vector<3x256xf32>
      %108 = arith.minimumf %107, %106 : vector<3x256xf32>
      %109 = arith.addf %42, %108 : vector<3x256xf32>
      %cst_27 = arith.constant 0.000000e+00 : f32
      %cst_28 = arith.constant 2.550000e+02 : f32
      %110 = vector.broadcast %cst_27 : f32 to vector<3x256xf32>
      %111 = arith.maximumf %110, %109 : vector<3x256xf32>
      %112 = vector.broadcast %cst_28 : f32 to vector<3x256xf32>
      %113 = arith.minimumf %112, %111 : vector<3x256xf32>
      scf.yield %113 : vector<3x256xf32>
    } else {
      scf.yield %42 : vector<3x256xf32>
    }
    %46 = math.floor %45 : vector<3x256xf32>
    %47 = arith.fptosi %46 : vector<3x256xf32> to vector<3x256xi32>
    %48 = arith.trunci %47 : vector<3x256xi32> to vector<3x256xi8>
    %c0_10 = arith.constant 0 : index
    %c0_11 = arith.constant 0 : index
    %c0_12 = arith.constant 0 : index
    %49 = vector.load %arg5[%c0_10, %c0_11, %c0_12] : memref<1x3x256xi8, #tpu.memory_space<vmem>>, vector<1x3x256xi8>
    %50 = vector.shape_cast %49 : vector<1x3x256xi8> to vector<3x256xi8>
    %51 = vector.shape_cast %48 : vector<3x256xi8> to vector<1x3x256xi8>
    tpu.vector_store %arg5[%c0_10, %c0_11, %c0_12], %51 {strides = array<i32>} : memref<1x3x256xi8, #tpu.memory_space<vmem>>, vector<1x3x256xi8>,
    return
  }
  func.func @transform_0(%arg0: i32, %arg1: i32) -> i32 {
    %c0_i32 = arith.constant 0 : i32
    %c0_i32_0 = arith.constant 0 : i32
    return %c0_i32 : i32
  }
  func.func @transform_1(%arg0: i32, %arg1: i32) -> i32 {
    %c0_i32 = arith.constant 0 : i32
    %c0_i32_0 = arith.constant 0 : i32
    return %c0_i32 : i32
  }
  func.func @transform_2(%arg0: i32, %arg1: i32) -> (i32, i32, i32) {
    %c0_i32 = arith.constant 0 : i32
    %c0_i32_0 = arith.constant 0 : i32
    return %arg0, %arg1, %c0_i32 : i32, i32, i32
  }
  func.func @transform_3(%arg0: i32, %arg1: i32) -> (i32, i32, i32) {
    %c0_i32 = arith.constant 0 : i32
    %c0_i32_0 = arith.constant 0 : i32
    return %arg0, %arg1, %c0_i32 : i32, i32, i32
  }
}

module attributes {stable_mosaic.version = 11 : i64} {
  func.func @_blur_minmax_kernel(%arg0: i32, %arg1: memref<2xi32, #tpu.memory_space<smem>>, %arg2: memref<16x16xbf16, #tpu.memory_space<vmem>>, %arg3: memref<16x16xbf16, #tpu.memory_space<vmem>>, %arg4: memref<1x16x16xbf16, #tpu.memory_space<vmem>>, %arg5: memref<1x1x16xf32, #tpu.memory_space<vmem>>, %arg6: memref<1x1x16xf32, #tpu.memory_space<vmem>>) attributes {dimension_semantics = [#tpu.dimension_semantics<parallel>], iteration_bounds = array<i64: 2>, scalar_prefetch = 0 : i64, scratch_operands = 0 : i64, tpu.core_type = #tpu.core_type<tc>, window_params = [{transform_indices = @transform_0, window_bounds = array<i64: 2>}, {pipeline_mode = #tpu.pipeline_mode<synchronous>, transform_indices = @transform_1, window_bounds = array<i64: 16, 16>}, {pipeline_mode = #tpu.pipeline_mode<synchronous>, transform_indices = @transform_2, window_bounds = array<i64: 16, 16>}, {transform_indices = @transform_3, window_bounds = array<i64: 1, 16, 16>}, {transform_indices = @transform_4, window_bounds = array<i64: 1, 1, 16>}, {transform_indices = @transform_5, window_bounds = array<i64: 1, 1, 16>}]} {
    %0 = arith.index_cast %arg0 : i32 to index
    %1 = memref.load %arg1[%0] : memref<2xi32, #tpu.memory_space<smem>>
    %2 = tpu.iota {dimensions = array<i32: 0>} : vector<16x16xi32>
    %3 = tpu.iota {dimensions = array<i32: 1>} : vector<16x16xi32>
    %c16_i32 = arith.constant 16 : i32
    %4 = vector.broadcast %c16_i32 : i32 to vector<16x16xi32>
    %5 = arith.muli %2, %4 : vector<16x16xi32>
    %6 = arith.addi %5, %3 : vector<16x16xi32>
    %c-1640531535_i32 = arith.constant -1640531535 : i32
    %7 = vector.broadcast %c-1640531535_i32 : i32 to vector<16x16xi32>
    %8 = arith.muli %6, %7 : vector<16x16xi32>
    %c608135816_i32 = arith.constant 608135816 : i32
    %9 = arith.xori %1, %c608135816_i32 : i32
    %10 = vector.broadcast %9 : i32 to vector<16x16xi32>
    %11 = arith.addi %8, %10 : vector<16x16xi32>
    %c15_i32 = arith.constant 15 : i32
    %12 = vector.broadcast %c15_i32 : i32 to vector<16x16xi32>
    %13 = arith.shrui %11, %12 : vector<16x16xi32>
    %14 = arith.xori %11, %13 : vector<16x16xi32>
    %c-2048144789_i32 = arith.constant -2048144789 : i32
    %15 = vector.broadcast %c-2048144789_i32 : i32 to vector<16x16xi32>
    %16 = arith.muli %14, %15 : vector<16x16xi32>
    %c13_i32 = arith.constant 13 : i32
    %17 = vector.broadcast %c13_i32 : i32 to vector<16x16xi32>
    %18 = arith.shrui %16, %17 : vector<16x16xi32>
    %19 = arith.xori %16, %18 : vector<16x16xi32>
    %c-1028477387_i32 = arith.constant -1028477387 : i32
    %20 = vector.broadcast %c-1028477387_i32 : i32 to vector<16x16xi32>
    %21 = arith.muli %19, %20 : vector<16x16xi32>
    %c16_i32_0 = arith.constant 16 : i32
    %22 = vector.broadcast %c16_i32_0 : i32 to vector<16x16xi32>
    %23 = arith.shrui %21, %22 : vector<16x16xi32>
    %24 = arith.xori %21, %23 : vector<16x16xi32>
    %c8_i32 = arith.constant 8 : i32
    %25 = vector.broadcast %c8_i32 : i32 to vector<16x16xi32>
    %26 = arith.shrui %24, %25 : vector<16x16xi32>
    %27 = arith.sitofp %26 : vector<16x16xi32> to vector<16x16xf32>
    %cst = arith.constant 5.96046448E-8 : f32
    %28 = vector.broadcast %cst : f32 to vector<16x16xf32>
    %29 = arith.mulf %27, %28 : vector<16x16xf32>
    %30 = arith.truncf %29 : vector<16x16xf32> to vector<16x16xbf16>
    %c0 = arith.constant 0 : index
    %c0_1 = arith.constant 0 : index
    %31 = vector.load %arg3[%c0, %c0_1] : memref<16x16xbf16, #tpu.memory_space<vmem>>, vector<16x16xbf16>
    %cst_2 = arith.constant dense<0.000000e+00> : vector<16x16xf32>
    %32 = tpu.matmul %30, %31, %cst_2 {dimension_numbers = #tpu.dot_dimension_numbers<[1], [0], [0], [1], [0, 0, 1, 1], [], []>} : vector<16x16xbf16>, vector<16x16xbf16>, vector<16x16xf32> -> vector<16x16xf32>
    %c0_3 = arith.constant 0 : index
    %c0_4 = arith.constant 0 : index
    %33 = vector.load %arg2[%c0_3, %c0_4] : memref<16x16xbf16, #tpu.memory_space<vmem>>, vector<16x16xbf16>
    %34 = arith.truncf %32 : vector<16x16xf32> to vector<16x16xbf16>
    %cst_5 = arith.constant dense<0.000000e+00> : vector<16x16xf32>
    %35 = tpu.matmul %33, %34, %cst_5 {dimension_numbers = #tpu.dot_dimension_numbers<[1], [0], [0], [1], [0, 0, 1, 1], [], []>} : vector<16x16xbf16>, vector<16x16xbf16>, vector<16x16xf32> -> vector<16x16xf32>
    %36 = arith.truncf %35 : vector<16x16xf32> to vector<16x16xbf16>
    %c0_6 = arith.constant 0 : index
    %c0_7 = arith.constant 0 : index
    %c0_8 = arith.constant 0 : index
    %37 = vector.load %arg4[%c0_6, %c0_7, %c0_8] : memref<1x16x16xbf16, #tpu.memory_space<vmem>>, vector<1x16x16xbf16>
    %38 = vector.shape_cast %37 : vector<1x16x16xbf16> to vector<16x16xbf16>
    %39 = vector.shape_cast %36 : vector<16x16xbf16> to vector<1x16x16xbf16>
    tpu.vector_store %arg4[%c0_6, %c0_7, %c0_8], %39 {strides = array<i32>} : memref<1x16x16xbf16, #tpu.memory_space<vmem>>, vector<1x16x16xbf16>,
    %cst_9 = arith.constant dense<0x7F800000> : vector<16xf32>
    %40 = vector.multi_reduction <minimumf>, %35, %cst_9 [0] : vector<16x16xf32> to vector<16xf32>
    %41 = vector.shape_cast %40 : vector<16xf32> to vector<1x16xf32>
    %c0_10 = arith.constant 0 : index
    %c0_11 = arith.constant 0 : index
    %c0_12 = arith.constant 0 : index
    %42 = vector.load %arg5[%c0_10, %c0_11, %c0_12] : memref<1x1x16xf32, #tpu.memory_space<vmem>>, vector<1x1x16xf32>
    %43 = vector.shape_cast %42 : vector<1x1x16xf32> to vector<1x16xf32>
    %44 = vector.shape_cast %41 : vector<1x16xf32> to vector<1x1x16xf32>
    tpu.vector_store %arg5[%c0_10, %c0_11, %c0_12], %44 {strides = array<i32>} : memref<1x1x16xf32, #tpu.memory_space<vmem>>, vector<1x1x16xf32>,
    %cst_13 = arith.constant dense<0xFF800000> : vector<16xf32>
    %45 = vector.multi_reduction <maximumf>, %35, %cst_13 [0] : vector<16x16xf32> to vector<16xf32>
    %46 = vector.shape_cast %45 : vector<16xf32> to vector<1x16xf32>
    %c0_14 = arith.constant 0 : index
    %c0_15 = arith.constant 0 : index
    %c0_16 = arith.constant 0 : index
    %47 = vector.load %arg6[%c0_14, %c0_15, %c0_16] : memref<1x1x16xf32, #tpu.memory_space<vmem>>, vector<1x1x16xf32>
    %48 = vector.shape_cast %47 : vector<1x1x16xf32> to vector<1x16xf32>
    %49 = vector.shape_cast %46 : vector<1x16xf32> to vector<1x1x16xf32>
    tpu.vector_store %arg6[%c0_14, %c0_15, %c0_16], %49 {strides = array<i32>} : memref<1x1x16xf32, #tpu.memory_space<vmem>>, vector<1x1x16xf32>,
    return
  }
  func.func @transform_0(%arg0: i32) -> i32 {
    %c0_i32 = arith.constant 0 : i32
    %c0_i32_0 = arith.constant 0 : i32
    return %c0_i32 : i32
  }
  func.func @transform_1(%arg0: i32) -> (i32, i32) {
    %c0_i32 = arith.constant 0 : i32
    %c0_i32_0 = arith.constant 0 : i32
    %c0_i32_1 = arith.constant 0 : i32
    return %c0_i32, %c0_i32_0 : i32, i32
  }
  func.func @transform_2(%arg0: i32) -> (i32, i32) {
    %c0_i32 = arith.constant 0 : i32
    %c0_i32_0 = arith.constant 0 : i32
    %c0_i32_1 = arith.constant 0 : i32
    return %c0_i32, %c0_i32_0 : i32, i32
  }
  func.func @transform_3(%arg0: i32) -> (i32, i32, i32) {
    %c0_i32 = arith.constant 0 : i32
    %c0_i32_0 = arith.constant 0 : i32
    %c0_i32_1 = arith.constant 0 : i32
    return %arg0, %c0_i32, %c0_i32_0 : i32, i32, i32
  }
  func.func @transform_4(%arg0: i32) -> (i32, i32, i32) {
    %c0_i32 = arith.constant 0 : i32
    %c0_i32_0 = arith.constant 0 : i32
    %c0_i32_1 = arith.constant 0 : i32
    return %arg0, %c0_i32, %c0_i32_0 : i32, i32, i32
  }
  func.func @transform_5(%arg0: i32) -> (i32, i32, i32) {
    %c0_i32 = arith.constant 0 : i32
    %c0_i32_0 = arith.constant 0 : i32
    %c0_i32_1 = arith.constant 0 : i32
    return %arg0, %c0_i32, %c0_i32_0 : i32, i32, i32
  }
}

module attributes {stable_mosaic.version = 11 : i64} {
  func.func @_depth_point_valid_kernel(%arg0: i32, %arg1: i32, %arg2: memref<30xf32, #tpu.memory_space<smem>>, %arg3: memref<2xi32, #tpu.memory_space<smem>>, %arg4: memref<1x16x16xf32, #tpu.memory_space<vmem>>, %arg5: memref<1x16x16xbf16, #tpu.memory_space<vmem>>, %arg6: memref<1x16x16xi8, #tpu.memory_space<vmem>>, %arg7: memref<1x16x16xf32, #tpu.memory_space<vmem>>, %arg8: memref<1x3x16x16xf32, #tpu.memory_space<vmem>>, %arg9: memref<1x16x16xi8, #tpu.memory_space<vmem>>) attributes {dimension_semantics = [#tpu.dimension_semantics<parallel>, #tpu.dimension_semantics<parallel>], iteration_bounds = array<i64: 2, 1>, scalar_prefetch = 0 : i64, scratch_operands = 0 : i64, tpu.core_type = #tpu.core_type<tc>, window_params = [{transform_indices = @transform_0, window_bounds = array<i64: 30>}, {transform_indices = @transform_1, window_bounds = array<i64: 2>}, {transform_indices = @transform_2, window_bounds = array<i64: 1, 16, 16>}, {transform_indices = @transform_3, window_bounds = array<i64: 1, 16, 16>}, {transform_indices = @transform_4, window_bounds = array<i64: 1, 16, 16>}, {transform_indices = @transform_5, window_bounds = array<i64: 1, 16, 16>}, {transform_indices = @transform_6, window_bounds = array<i64: 1, 3, 16, 16>}, {transform_indices = @transform_7, window_bounds = array<i64: 1, 16, 16>}]} {
    %c15_i32 = arith.constant 15 : i32
    %0 = arith.muli %arg0, %c15_i32 : i32
    %1 = arith.index_cast %arg0 : i32 to index
    %2 = memref.load %arg3[%1] : memref<2xi32, #tpu.memory_space<smem>>
    %3 = tpu.iota {dimensions = array<i32: 1>} : vector<16x16xi32>
    %4 = tpu.iota {dimensions = array<i32: 0>} : vector<16x16xi32>
    %c16_i32 = arith.constant 16 : i32
    %5 = arith.muli %arg1, %c16_i32 : i32
    %6 = vector.broadcast %5 : i32 to vector<16x16xi32>
    %7 = arith.addi %4, %6 : vector<16x16xi32>
    %c16_i32_0 = arith.constant 16 : i32
    %8 = vector.broadcast %c16_i32_0 : i32 to vector<16x16xi32>
    %9 = arith.muli %7, %8 : vector<16x16xi32>
    %10 = arith.addi %9, %3 : vector<16x16xi32>
    %c-1640531535_i32 = arith.constant -1640531535 : i32
    %11 = vector.broadcast %c-1640531535_i32 : i32 to vector<16x16xi32>
    %12 = arith.muli %10, %11 : vector<16x16xi32>
    %c320440878_i32 = arith.constant 320440878 : i32
    %13 = arith.xori %2, %c320440878_i32 : i32
    %14 = vector.broadcast %13 : i32 to vector<16x16xi32>
    %15 = arith.addi %12, %14 : vector<16x16xi32>
    %c15_i32_1 = arith.constant 15 : i32
    %16 = vector.broadcast %c15_i32_1 : i32 to vector<16x16xi32>
    %17 = arith.shrui %15, %16 : vector<16x16xi32>
    %18 = arith.xori %15, %17 : vector<16x16xi32>
    %c-2048144789_i32 = arith.constant -2048144789 : i32
    %19 = vector.broadcast %c-2048144789_i32 : i32 to vector<16x16xi32>
    %20 = arith.muli %18, %19 : vector<16x16xi32>
    %c13_i32 = arith.constant 13 : i32
    %21 = vector.broadcast %c13_i32 : i32 to vector<16x16xi32>
    %22 = arith.shrui %20, %21 : vector<16x16xi32>
    %23 = arith.xori %20, %22 : vector<16x16xi32>
    %c-1028477387_i32 = arith.constant -1028477387 : i32
    %24 = vector.broadcast %c-1028477387_i32 : i32 to vector<16x16xi32>
    %25 = arith.muli %23, %24 : vector<16x16xi32>
    %c16_i32_2 = arith.constant 16 : i32
    %26 = vector.broadcast %c16_i32_2 : i32 to vector<16x16xi32>
    %27 = arith.shrui %25, %26 : vector<16x16xi32>
    %28 = arith.xori %25, %27 : vector<16x16xi32>
    %c8_i32 = arith.constant 8 : i32
    %29 = vector.broadcast %c8_i32 : i32 to vector<16x16xi32>
    %30 = arith.shrui %28, %29 : vector<16x16xi32>
    %31 = arith.sitofp %30 : vector<16x16xi32> to vector<16x16xf32>
    %cst = arith.constant 5.96046448E-8 : f32
    %32 = vector.broadcast %cst : f32 to vector<16x16xf32>
    %33 = arith.mulf %31, %32 : vector<16x16xf32>
    %c-1640531535_i32_3 = arith.constant -1640531535 : i32
    %34 = vector.broadcast %c-1640531535_i32_3 : i32 to vector<16x16xi32>
    %35 = arith.muli %10, %34 : vector<16x16xi32>
    %c57701188_i32 = arith.constant 57701188 : i32
    %36 = arith.xori %2, %c57701188_i32 : i32
    %37 = vector.broadcast %36 : i32 to vector<16x16xi32>
    %38 = arith.addi %35, %37 : vector<16x16xi32>
    %c15_i32_4 = arith.constant 15 : i32
    %39 = vector.broadcast %c15_i32_4 : i32 to vector<16x16xi32>
    %40 = arith.shrui %38, %39 : vector<16x16xi32>
    %41 = arith.xori %38, %40 : vector<16x16xi32>
    %c-2048144789_i32_5 = arith.constant -2048144789 : i32
    %42 = vector.broadcast %c-2048144789_i32_5 : i32 to vector<16x16xi32>
    %43 = arith.muli %41, %42 : vector<16x16xi32>
    %c13_i32_6 = arith.constant 13 : i32
    %44 = vector.broadcast %c13_i32_6 : i32 to vector<16x16xi32>
    %45 = arith.shrui %43, %44 : vector<16x16xi32>
    %46 = arith.xori %43, %45 : vector<16x16xi32>
    %c-1028477387_i32_7 = arith.constant -1028477387 : i32
    %47 = vector.broadcast %c-1028477387_i32_7 : i32 to vector<16x16xi32>
    %48 = arith.muli %46, %47 : vector<16x16xi32>
    %c16_i32_8 = arith.constant 16 : i32
    %49 = vector.broadcast %c16_i32_8 : i32 to vector<16x16xi32>
    %50 = arith.shrui %48, %49 : vector<16x16xi32>
    %51 = arith.xori %48, %50 : vector<16x16xi32>
    %c8_i32_9 = arith.constant 8 : i32
    %52 = vector.broadcast %c8_i32_9 : i32 to vector<16x16xi32>
    %53 = arith.shrui %51, %52 : vector<16x16xi32>
    %54 = arith.sitofp %53 : vector<16x16xi32> to vector<16x16xf32>
    %cst_10 = arith.constant 5.96046448E-8 : f32
    %55 = vector.broadcast %cst_10 : f32 to vector<16x16xf32>
    %56 = arith.mulf %54, %55 : vector<16x16xf32>
    %57 = arith.addf %33, %56 : vector<16x16xf32>
    %cst_11 = arith.constant 1.000000e+00 : f32
    %58 = vector.broadcast %cst_11 : f32 to vector<16x16xf32>
    %59 = arith.subf %57, %58 : vector<16x16xf32>
    %cst_12 = arith.constant 2.44948959 : f32
    %60 = vector.broadcast %cst_12 : f32 to vector<16x16xf32>
    %61 = arith.mulf %59, %60 : vector<16x16xf32>
    %c0 = arith.constant 0 : index
    %c0_13 = arith.constant 0 : index
    %c0_14 = arith.constant 0 : index
    %62 = vector.load %arg4[%c0, %c0_13, %c0_14] : memref<1x16x16xf32, #tpu.memory_space<vmem>>, vector<1x16x16xf32>
    %63 = vector.shape_cast %62 : vector<1x16x16xf32> to vector<16x16xf32>
    %c12_i32 = arith.constant 12 : i32
    %64 = arith.addi %0, %c12_i32 : i32
    %65 = arith.index_cast %64 : i32 to index
    %66 = memref.load %arg2[%65] : memref<30xf32, #tpu.memory_space<smem>>
    %67 = vector.broadcast %66 : f32 to vector<16x16xf32>
    %68 = arith.mulf %61, %67 : vector<16x16xf32>
    %69 = arith.addf %63, %68 : vector<16x16xf32>
    %c0_15 = arith.constant 0 : index
    %c0_16 = arith.constant 0 : index
    %c0_17 = arith.constant 0 : index
    %70 = vector.load %arg7[%c0_15, %c0_16, %c0_17] : memref<1x16x16xf32, #tpu.memory_space<vmem>>, vector<1x16x16xf32>
    %71 = vector.shape_cast %70 : vector<1x16x16xf32> to vector<16x16xf32>
    %72 = vector.shape_cast %69 : vector<16x16xf32> to vector<1x16x16xf32>
    tpu.vector_store %arg7[%c0_15, %c0_16, %c0_17], %72 {strides = array<i32>} : memref<1x16x16xf32, #tpu.memory_space<vmem>>, vector<1x16x16xf32>,
    %73 = arith.sitofp %3 : vector<16x16xi32> to vector<16x16xf32>
    %74 = arith.sitofp %7 : vector<16x16xi32> to vector<16x16xf32>
    %c0_i32 = arith.constant 0 : i32
    %75 = arith.addi %0, %c0_i32 : i32
    %76 = arith.index_cast %75 : i32 to index
    %77 = memref.load %arg2[%76] : memref<30xf32, #tpu.memory_space<smem>>
    %78 = vector.broadcast %77 : f32 to vector<16x16xf32>
    %79 = arith.mulf %78, %73 : vector<16x16xf32>
    %c1_i32 = arith.constant 1 : i32
    %80 = arith.addi %0, %c1_i32 : i32
    %81 = arith.index_cast %80 : i32 to index
    %82 = memref.load %arg2[%81] : memref<30xf32, #tpu.memory_space<smem>>
    %83 = vector.broadcast %82 : f32 to vector<16x16xf32>
    %84 = arith.mulf %83, %74 : vector<16x16xf32>
    %85 = arith.addf %79, %84 : vector<16x16xf32>
    %c2_i32 = arith.constant 2 : i32
    %86 = arith.addi %0, %c2_i32 : i32
    %87 = arith.index_cast %86 : i32 to index
    %88 = memref.load %arg2[%87] : memref<30xf32, #tpu.memory_space<smem>>
    %89 = vector.broadcast %88 : f32 to vector<16x16xf32>
    %90 = arith.addf %85, %89 : vector<16x16xf32>
    %c3_i32 = arith.constant 3 : i32
    %91 = arith.addi %0, %c3_i32 : i32
    %92 = arith.index_cast %91 : i32 to index
    %93 = memref.load %arg2[%92] : memref<30xf32, #tpu.memory_space<smem>>
    %94 = vector.broadcast %93 : f32 to vector<16x16xf32>
    %95 = arith.mulf %94, %73 : vector<16x16xf32>
    %c4_i32 = arith.constant 4 : i32
    %96 = arith.addi %0, %c4_i32 : i32
    %97 = arith.index_cast %96 : i32 to index
    %98 = memref.load %arg2[%97] : memref<30xf32, #tpu.memory_space<smem>>
    %99 = vector.broadcast %98 : f32 to vector<16x16xf32>
    %100 = arith.mulf %99, %74 : vector<16x16xf32>
    %101 = arith.addf %95, %100 : vector<16x16xf32>
    %c5_i32 = arith.constant 5 : i32
    %102 = arith.addi %0, %c5_i32 : i32
    %103 = arith.index_cast %102 : i32 to index
    %104 = memref.load %arg2[%103] : memref<30xf32, #tpu.memory_space<smem>>
    %105 = vector.broadcast %104 : f32 to vector<16x16xf32>
    %106 = arith.addf %101, %105 : vector<16x16xf32>
    %c6_i32 = arith.constant 6 : i32
    %107 = arith.addi %0, %c6_i32 : i32
    %108 = arith.index_cast %107 : i32 to index
    %109 = memref.load %arg2[%108] : memref<30xf32, #tpu.memory_space<smem>>
    %110 = vector.broadcast %109 : f32 to vector<16x16xf32>
    %111 = arith.mulf %110, %73 : vector<16x16xf32>
    %c7_i32 = arith.constant 7 : i32
    %112 = arith.addi %0, %c7_i32 : i32
    %113 = arith.index_cast %112 : i32 to index
    %114 = memref.load %arg2[%113] : memref<30xf32, #tpu.memory_space<smem>>
    %115 = vector.broadcast %114 : f32 to vector<16x16xf32>
    %116 = arith.mulf %115, %74 : vector<16x16xf32>
    %117 = arith.addf %111, %116 : vector<16x16xf32>
    %c8_i32_18 = arith.constant 8 : i32
    %118 = arith.addi %0, %c8_i32_18 : i32
    %119 = arith.index_cast %118 : i32 to index
    %120 = memref.load %arg2[%119] : memref<30xf32, #tpu.memory_space<smem>>
    %121 = vector.broadcast %120 : f32 to vector<16x16xf32>
    %122 = arith.addf %117, %121 : vector<16x16xf32>
    %123 = arith.mulf %69, %90 : vector<16x16xf32>
    %c9_i32 = arith.constant 9 : i32
    %124 = arith.addi %0, %c9_i32 : i32
    %125 = arith.index_cast %124 : i32 to index
    %126 = memref.load %arg2[%125] : memref<30xf32, #tpu.memory_space<smem>>
    %127 = vector.broadcast %126 : f32 to vector<16x16xf32>
    %128 = arith.addf %123, %127 : vector<16x16xf32>
    %c0_19 = arith.constant 0 : index
    %c0_20 = arith.constant 0 : index
    %c0_21 = arith.constant 0 : index
    %c0_22 = arith.constant 0 : index
    %129 = vector.load %arg8[%c0_19, %c0_20, %c0_21, %c0_22] : memref<1x3x16x16xf32, #tpu.memory_space<vmem>>, vector<1x1x16x16xf32>
    %130 = vector.shape_cast %129 : vector<1x1x16x16xf32> to vector<16x16xf32>
    %131 = vector.shape_cast %128 : vector<16x16xf32> to vector<1x1x16x16xf32>
    tpu.vector_store %arg8[%c0_19, %c0_20, %c0_21, %c0_22], %131 {strides = array<i32>} : memref<1x3x16x16xf32, #tpu.memory_space<vmem>>, vector<1x1x16x16xf32>,
    %132 = arith.mulf %69, %106 : vector<16x16xf32>
    %c10_i32 = arith.constant 10 : i32
    %133 = arith.addi %0, %c10_i32 : i32
    %134 = arith.index_cast %133 : i32 to index
    %135 = memref.load %arg2[%134] : memref<30xf32, #tpu.memory_space<smem>>
    %136 = vector.broadcast %135 : f32 to vector<16x16xf32>
    %137 = arith.addf %132, %136 : vector<16x16xf32>
    %c0_23 = arith.constant 0 : index
    %c1 = arith.constant 1 : index
    %c0_24 = arith.constant 0 : index
    %c0_25 = arith.constant 0 : index
    %138 = vector.load %arg8[%c0_23, %c1, %c0_24, %c0_25] : memref<1x3x16x16xf32, #tpu.memory_space<vmem>>, vector<1x1x16x16xf32>
    %139 = vector.shape_cast %138 : vector<1x1x16x16xf32> to vector<16x16xf32>
    %140 = vector.shape_cast %137 : vector<16x16xf32> to vector<1x1x16x16xf32>
    tpu.vector_store %arg8[%c0_23, %c1, %c0_24, %c0_25], %140 {strides = array<i32>} : memref<1x3x16x16xf32, #tpu.memory_space<vmem>>, vector<1x1x16x16xf32>,
    %141 = arith.mulf %69, %122 : vector<16x16xf32>
    %c11_i32 = arith.constant 11 : i32
    %142 = arith.addi %0, %c11_i32 : i32
    %143 = arith.index_cast %142 : i32 to index
    %144 = memref.load %arg2[%143] : memref<30xf32, #tpu.memory_space<smem>>
    %145 = vector.broadcast %144 : f32 to vector<16x16xf32>
    %146 = arith.addf %141, %145 : vector<16x16xf32>
    %c0_26 = arith.constant 0 : index
    %c2 = arith.constant 2 : index
    %c0_27 = arith.constant 0 : index
    %c0_28 = arith.constant 0 : index
    %147 = vector.load %arg8[%c0_26, %c2, %c0_27, %c0_28] : memref<1x3x16x16xf32, #tpu.memory_space<vmem>>, vector<1x1x16x16xf32>
    %148 = vector.shape_cast %147 : vector<1x1x16x16xf32> to vector<16x16xf32>
    %149 = vector.shape_cast %146 : vector<16x16xf32> to vector<1x1x16x16xf32>
    tpu.vector_store %arg8[%c0_26, %c2, %c0_27, %c0_28], %149 {strides = array<i32>} : memref<1x3x16x16xf32, #tpu.memory_space<vmem>>, vector<1x1x16x16xf32>,
    %c0_29 = arith.constant 0 : index
    %c0_30 = arith.constant 0 : index
    %c0_31 = arith.constant 0 : index
    %150 = vector.load %arg5[%c0_29, %c0_30, %c0_31] : memref<1x16x16xbf16, #tpu.memory_space<vmem>>, vector<1x16x16xbf16>
    %151 = vector.shape_cast %150 : vector<1x16x16xbf16> to vector<16x16xbf16>
    %152 = arith.extf %151 : vector<16x16xbf16> to vector<16x16xf32>
    %c13_i32_32 = arith.constant 13 : i32
    %153 = arith.addi %0, %c13_i32_32 : i32
    %154 = arith.index_cast %153 : i32 to index
    %155 = memref.load %arg2[%154] : memref<30xf32, #tpu.memory_space<smem>>
    %156 = vector.broadcast %155 : f32 to vector<16x16xf32>
    %157 = arith.cmpf ogt, %152, %156 : vector<16x16xf32>
    %c14_i32 = arith.constant 14 : i32
    %158 = arith.addi %0, %c14_i32 : i32
    %159 = arith.index_cast %158 : i32 to index
    %160 = memref.load %arg2[%159] : memref<30xf32, #tpu.memory_space<smem>>
    %cst_33 = arith.constant 5.000000e-01 : f32
    %161 = arith.cmpf ogt, %160, %cst_33 : f32
    %162 = vector.broadcast %161 : i1 to vector<16x16xi1>
    %163 = arith.andi %157, %162 : vector<16x16xi1>
    %c0_34 = arith.constant 0 : index
    %c0_35 = arith.constant 0 : index
    %c0_36 = arith.constant 0 : index
    %164 = vector.load %arg6[%c0_34, %c0_35, %c0_36] : memref<1x16x16xi8, #tpu.memory_space<vmem>>, vector<1x16x16xi8>
    %165 = vector.shape_cast %164 : vector<1x16x16xi8> to vector<16x16xi8>
    %166 = arith.extui %165 : vector<16x16xi8> to vector<16x16xi32>
    %c0_i32_37 = arith.constant 0 : i32
    %167 = vector.broadcast %c0_i32_37 : i32 to vector<16x16xi32>
    %168 = arith.select %163, %167, %166 : vector<16x16xi1>, vector<16x16xi32>
    %169 = arith.trunci %168 : vector<16x16xi32> to vector<16x16xi8>
    %c0_38 = arith.constant 0 : index
    %c0_39 = arith.constant 0 : index
    %c0_40 = arith.constant 0 : index
    %170 = vector.load %arg9[%c0_38, %c0_39, %c0_40] : memref<1x16x16xi8, #tpu.memory_space<vmem>>, vector<1x16x16xi8>
    %171 = vector.shape_cast %170 : vector<1x16x16xi8> to vector<16x16xi8>
    %172 = vector.shape_cast %169 : vector<16x16xi8> to vector<1x16x16xi8>
    tpu.vector_store %arg9[%c0_38, %c0_39, %c0_40], %172 {strides = array<i32>} : memref<1x16x16xi8, #tpu.memory_space<vmem>>, vector<1x16x16xi8>,
    return
  }
  func.func @transform_0(%arg0: i32, %arg1: i32) -> i32 {
    %c0_i32 = arith.constant 0 : i32
    %c0_i32_0 = arith.constant 0 : i32
    return %c0_i32 : i32
  }
  func.func @transform_1(%arg0: i32, %arg1: i32) -> i32 {
    %c0_i32 = arith.constant 0 : i32
    %c0_i32_0 = arith.constant 0 : i32
    return %c0_i32 : i32
  }
  func.func @transform_2(%arg0: i32, %arg1: i32) -> (i32, i32, i32) {
    %c0_i32 = arith.constant 0 : i32
    %c0_i32_0 = arith.constant 0 : i32
    return %arg0, %arg1, %c0_i32 : i32, i32, i32
  }
  func.func @transform_3(%arg0: i32, %arg1: i32) -> (i32, i32, i32) {
    %c0_i32 = arith.constant 0 : i32
    %c0_i32_0 = arith.constant 0 : i32
    return %arg0, %arg1, %c0_i32 : i32, i32, i32
  }
  func.func @transform_4(%arg0: i32, %arg1: i32) -> (i32, i32, i32) {
    %c0_i32 = arith.constant 0 : i32
    %c0_i32_0 = arith.constant 0 : i32
    return %arg0, %arg1, %c0_i32 : i32, i32, i32
  }
  func.func @transform_5(%arg0: i32, %arg1: i32) -> (i32, i32, i32) {
    %c0_i32 = arith.constant 0 : i32
    %c0_i32_0 = arith.constant 0 : i32
    return %arg0, %arg1, %c0_i32 : i32, i32, i32
  }
  func.func @transform_6(%arg0: i32, %arg1: i32) -> (i32, i32, i32, i32) {
    %c0_i32 = arith.constant 0 : i32
    %c0_i32_0 = arith.constant 0 : i32
    %c0_i32_1 = arith.constant 0 : i32
    return %arg0, %c0_i32, %arg1, %c0_i32_0 : i32, i32, i32, i32
  }
  func.func @transform_7(%arg0: i32, %arg1: i32) -> (i32, i32, i32) {
    %c0_i32 = arith.constant 0 : i32
    %c0_i32_0 = arith.constant 0 : i32
    return %arg0, %arg1, %c0_i32 : i32, i32, i32
  }
}

</mosaic_0001>

<bundles_post_ra>
// kernel: augmentor_forward.7
= control target key start
LH: loop header
LB: loop body
LE: loop exit
PB: predicated region body
PF: predicated region fallthrough
CT: control target
= control target key end

     0   :  { %8 = vsyncpa [#allocation3], 0  ;;  %s952_s0 = inlined_call_operand.vmem [shape: f32[8], index: 0, kind: input, shape index: {}]   ;;  %s953_s1 = inlined_call_operand.vmem [shape: s32[2], index: 1, kind: input, shape index: {}]   ;;  %s954_s2 = inlined_call_operand.vmem [shape: u8[2,3,256], index: 2, kind: input, shape index: {}]   ;;  %s955_s3 = inlined_call_operand.vmem [shape: u8[2,3,256], index: 3, kind: output, shape index: {}]  }
   0x1   :  { %9 = vsyncpa [#allocation5], 0  ;;  %s810_s12 = smov 0   ;;  %s812_s13 = smov 0  }
   0x2   :  { %s814_s14 = smov 0  }
   0x3 LB: > { %s567_s15 = sadd.s32 4294967295, %s785_s14   ;;  %s27_s16 = sadd.s32 1, %s781_s13  ;;  %s785_s14 = sphi %s814_s14, %s15_s14   ;;  %s781_s13 = sphi %s812_s13, %s969_s13   ;;  %s777_s12 = sphi %s810_s12, %s968_s12  }
   0x4   : > { %p29_p0 = scmp.ge.s32.totalorder %s27_s16, 2  ;;  %p569_p1 = scmp.ge.s32.totalorder %s785_s14, 1 }
   0x5   : > { %p130_p2 = scmp.lt.s32.totalorder %s785_s14, 3  ;;  %p835_p4 = scmp.eq.s32.totalorder %s567_s15, 0 }
   0x6   : > { %s971_s16 = smov (%p29_p0, %s27_s16), 0  ;;  %s143_s21 = sshll.u32 %s952_s0, 4  ;;  %s144_s21 = int_to_ptr.vmem [resolvable:$true] %s143_s21 }
   0x7   : > { %p831_p3 = pnand %p569_p1, %p130_p2  ;;  %s154_s24 = sshll.u32 %s953_s1, 4  ;;  %s155_s24 = int_to_ptr.vmem [resolvable:$true] %s154_s24 }
   0x8   : > { %s960_s18 = scalar_select %p835_p4, 1, 0 }
   0x9   : > { %s959_s17 = scalar_select %p831_p3, 1, 0 }
   0xa   : > { %p673_p5 = pneg %p831_p3  ;;  %s725_s26 = scalar_lea.vmem %s144_s21, 16 }
   0xb   : > { %p726_p7 = scmp.ne.s32.totalorder %s144_s21, %s725_s26  ;;  %p733_p11 = scmp.lt.s32.totalorder %s144_s21, %s144_s21 }
   0xc   : > { %p849_p6 = pnand %p835_p4, %p673_p5  ;;  %p734_p12 = scmp.lt.s32.totalorder %s725_s26, %s725_s26 }
   0xe   : > { %p727_p8 = pneg %p849_p6  ;;  %p735_p13 = por %p734_p12, %p733_p11 }
  0x10   : > { %p728_p9 = pnand %p727_p8, %p726_p7 }
  0x12   : > { %p729_p10 = pneg %p728_p9 }
  0x14   : > { %p736_p0 = pnand %p735_p13, %p729_p10 }
  0x16   : > { %739 = shalt.err (!%p736_p0)
}
  0x17   : > { %s787_s27 = smov [#allocation2]   ;;  %s740_s28 = scalar_lea.vmem %s155_s24, 16 }
  0x18   : > { %676 = dma.vmem_to_smem (!%p849_p6), %s144_s21, 16, %s787_s27, [#allocation3]  }
  0x19   : > { %p741_p1 = scmp.ne.s32.totalorder %s155_s24, %s740_s28  ;;  %p748_p4 = scmp.lt.s32.totalorder %s155_s24, %s155_s24 }
  0x1a   : > { %p749_p3 = scmp.lt.s32.totalorder %s740_s28, %s740_s28 }
  0x1b   : > { %p743_p2 = pnand %p741_p1, %p727_p8 }
  0x1c   : > { %p750_p7 = por %p749_p3, %p748_p4 }
  0x1d   : > { %p744_p5 = pneg %p743_p2 }
  0x1f   : > { %p751_p9 = pnand %p750_p7, %p744_p5 }
  0x21   : > { %754 = shalt.err (!%p751_p9)
}
  0x22   : > { %s788_s29 = smov [#allocation4]   ;;  %p962_p10 = scmp.ne.s32.totalorder %s959_s17, 0 }
  0x23   : > { %679 = dma.vmem_to_smem (!%p849_p6), %s155_s24, 16, %s788_s29, [#allocation5]  }
  0x24   : > { %178 = sbr.rel (%p962_p10) target bundleno = 166 (0xa6), region = 32  ;;  %p963_p11 = scmp.ne.s32.totalorder (!%p962_p10), %s960_s18, 0 }
  0x29   : > { %768 = dma.done.wait (%p963_p11), [#allocation3], 16  }
  0x2a   : > { %770 = vsyncadd (%p963_p11), [#allocation3], 4294967280 }
  0x2b   : > { %772 = dma.done.wait (%p963_p11), [#allocation5], 16  }
  0x2c   : > { %774 = vsyncadd (%p963_p11), [#allocation5], 4294967280 }
  0x2d   : > { %188 = sfence }
  0x2e   : > { %p213_p3 = scmp.lt.s32.totalorder %s777_s12, 1  ;;  %s578_s30 = sshll.u32 %s777_s12, 2  ;;  %v240_v0 = vlaneseq  ;;  %vm451_vm15 = vcmask 1040384  }
  0x2f   : > { %s230_s4 = sld [smem:[#allocation2 + %s578_s30]]  ;;  %s231_s5 = sadd.s32 1, %s578_s30 }
  0x30   : > { %s872_s6 = scalar_select %p213_p3, %s777_s12, 1  ;;  %v874_v1 = vshrl.u32 %v240_v0, 7  ;;  %v246_v2 = vand.u32 127, %v240_v0 }
  0x31   : > { %s233_s7 = sadd.s32 2, %s578_s30  ;;  %s885_s17 = sld [smem:[#allocation2 + %s231_s5]] }
  0x32   : > { %s576_s8 = sshll.u32 %s872_s6, 1  ;;  %s877_s9 = sld [smem:[#allocation2 + %s233_s7]]  ;;  %v247_v3 = vadd.s32 128, %v246_v2  ;;  %v248_v4 = vmul.u32 256, %v874_v1 }
  0x33   : > { %s220_s15 = scalar_lea.vmem %s954_s2, %s576_s8  ;;  %s236_s18 = sadd.s32 3, %s578_s30 }
  0x34   : > { %s888_s19 = sld [smem:[#allocation4 + %s777_s12]]  ;;  %v249_v5 = vadd.s32 %v248_v4, %v246_v2  ;;  %v250_v6 = vadd.s32 %v248_v4, %v247_v3  ;;  %v251_v7 = vld [vmem:[%s220_s15] sm:$0x3] }
  0x35   : > { %v252_v8 = vunpack.c.0.s8 %v251_v7  ;;  %s890_s20 = sld [smem:[#allocation2 + %s236_s18]]  ;;  %v255_v10 = vstv %s230_s4  ;;  %s228_s4 = scalar_lea.vmem %s955_s3, %s576_s8 }
  0x36   : > { %v263_v11 = vmul.u32 2654435761, %v249_v5  ;;  %v264_v12 = vmul.u32 2654435761, %v250_v6 }
  0x37   : > { %v253_v9 = vand.u32 255, %v252_v8  ;;  %p308_p6 = scmp.ne.f32.partialorder %s885_s17, 1.0 }
  0x38   : > { %p235_p4 = scmp.gt.f32.partialorder %s877_s9, 0.5 }
  0x39   : > { %v254_v13 = vcvt.s32.f32 %v253_v9  ;;  %s639_s25 = scalar_select %p308_p6, 1, 0 }
  0x3a   : > { %s265_s21 = sxor.u32 2752067618, %s888_s19  ;;  %s351_s12 = sxor.u32 698298832, %s888_s19 }
  0x3b   : > { %v256_v14 = vmul.f32 %v255_v10, %v254_v13  ;;  %v266_v15 = vstv %s265_s21  ;;  %p238_p8 = scmp.gt.f32.partialorder %s890_s20, 0.5  ;;  %s377_s22 = sxor.u32 137296536, %s888_s19  ;;  %v352_v33 = vstv %s351_s12 }
  0x3c   : > { %v267_v16 = vadd.s32 %v266_v15, %v263_v11  ;;  %v268_v17 = vadd.s32 %v266_v15, %v264_v12  ;;  %v378_v37 = vstv %s377_s22  ;;  %s622_s23 = scalar_select %p235_p4, 1, 0  ;;  %v353_v40 = vadd.s32 %v352_v33, %v263_v11 }
  0x3d   : > { %v586_v18 = vand.u32 2147483647, %v256_v14  ;;  %v588_v19 = vcvt.f32.s32 %v256_v14  ;;  %v591_v23 = vand.u32 2147483648, %v256_v14  ;;  %s684_s24 = scalar_select %p235_p4, 0, 1  ;;  %v379_v42 = vadd.s32 %v378_v37, %v263_v11 }
  0x3e   : > { %v269_v20 = vshrl.u32 %v267_v16, 15  ;;  %v270_v21 = vshrl.u32 %v268_v17, 15  ;;  %v354_v45 = vadd.s32 %v352_v33, %v264_v12  ;;  %v380_v46 = vadd.s32 %v378_v37, %v264_v12  ;;  %s686_s26 = scalar_select %p308_p6, 0, 1 }
  0x3f   : > { %v589_v22 = vcvt.s32.f32 %v588_v19  ;;  %vm587_vm0 = vcmp.lt.f32.partialorder %v586_v18, 8388608.0  ;;  %v623_v47 = vstv %s622_s23  ;;  %v632_v50 = vstv %s684_s24  ;;  %s656_s27 = scalar_select %p238_p8, 1, 0 }
  0x40   : > { %v271_v24 = vxor.u32 %v269_v20, %v267_v16  ;;  %v272_v25 = vxor.u32 %v270_v21, %v268_v17  ;;  %v355_v51 = vshrl.u32 %v353_v40, 15  ;;  %v381_v53 = vshrl.u32 %v379_v42, 15  ;;  %s688_s28 = scalar_select %p238_p8, 0, 1 }
  0x41   : > { %v590_v26 = vand.u32 2147483647, %v589_v22  ;;  %v356_v56 = vshrl.u32 %v354_v45, 15  ;;  %v382_v57 = vshrl.u32 %v380_v46, 15  ;;  %vm902_vm1 = vcmp.ne.s32.totalorder %v623_v47, 0 }
  0x42   : > { %v273_v27 = vmul.u32 2246822507, %v271_v24  ;;  %v274_v28 = vmul.u32 2246822507, %v272_v25  ;;  %vm906_vm2 = vcmp.ne.s32.totalorder %v632_v50, 0  ;;  %v357_v60 = vxor.u32 %v355_v51, %v353_v40 }
  0x43   : > { %v592_v29 = vor.u32 %v591_v23, %v590_v26  ;;  %v383_v63 = vxor.u32 %v381_v53, %v379_v42  ;;  %v358_v3 = vxor.u32 %v356_v56, %v354_v45  ;;  %v384_v4 = vxor.u32 %v382_v57, %v380_v46 }
  0x44   : > { %v275_v30 = vshrl.u32 %v273_v27, 13  ;;  %v276_v31 = vshrl.u32 %v274_v28, 13  ;;  %v359_v9 = vmul.u32 2246822507, %v357_v60 }
  0x45   : > { %v593_v32 = vsel %vm587_vm0, %v592_v29, %v256_v14  ;;  %v385_v12 = vmul.u32 2246822507, %v383_v63  ;;  %v360_v13 = vmul.u32 2246822507, %v358_v3  ;;  %vm452_vm0 = vsmask.f32 512 }
  0x46   : > { %v258_v34 = vmax.f32 %v593_v32, 0.0  ;;  %v277_v35 = vxor.u32 %v275_v30, %v273_v27  ;;  %v278_v36 = vxor.u32 %v276_v31, %v274_v28  ;;  %v386_v14 = vmul.u32 2246822507, %v384_v4 }
  0x47   : > { %v361_v17 = vshrl.u32 %v359_v9, 13  ;;  %v387_v18 = vshrl.u32 %v385_v12, 13  ;;  %v362_v19 = vshrl.u32 %v360_v13, 13  ;;  %v320_v32 = vstv %s885_s17 }
  0x48   : > { %v279_v38 = vmul.u32 3266489909, %v277_v35  ;;  %v280_v39 = vmul.u32 3266489909, %v278_v36  ;;  %v259_v41 = vmin.f32 %v258_v34, 255.0  ;;  %v388_v20 = vshrl.u32 %v386_v14, 13 }
  0x49   : > { %v363_v21 = vxor.u32 %v361_v17, %v359_v9  ;;  %v389_v22 = vxor.u32 %v387_v18, %v385_v12  ;;  %v364_v23 = vxor.u32 %v362_v19, %v360_v13 }
  0x4a   : > { %v281_v43 = vshrl.u32 %v279_v38, 16  ;;  %v282_v44 = vshrl.u32 %v280_v39, 16  ;;  %v290_v52 = vcombine.high %v259_v41, %v259_v41  ;;  %v390_v24 = vxor.u32 %v388_v20, %v386_v14 }
  0x4b   : > { %v365_v25 = vmul.u32 3266489909, %v363_v21  ;;  %v391_v26 = vmul.u32 3266489909, %v389_v22  ;;  %v640_v21 = vstv %s639_s25 }
  0x4c   : > { %v283_v48 = vxor.u32 %v281_v43, %v279_v38  ;;  %v284_v49 = vxor.u32 %v282_v44, %v280_v39  ;;  %v366_v27 = vmul.u32 3266489909, %v364_v23  ;;  %v392_v28 = vmul.u32 3266489909, %v390_v24 }
  0x4d   : > { %v367_v29 = vshrl.u32 %v365_v25, 16  ;;  %v393_v30 = vshrl.u32 %v391_v26, 16  ;;  %v649_v24 = vstv %s686_s26  ;;  %vm641_vm11 = vcmp.ne.s32.totalorder %v640_v21, 0 }
  0x4e   : > { %v285_v54 = vshrl.u32 %v283_v48, 1  ;;  %v286_v55 = vshrl.u32 %v284_v49, 1  ;;  %v368_v33 = vshrl.u32 %v366_v27, 16  ;;  %v394_v34 = vshrl.u32 %v392_v28, 16 }
  0x4f   : > { %v369_v39 = vxor.u32 %v367_v29, %v365_v25  ;;  %v395_v40 = vxor.u32 %v393_v30, %v391_v26  ;;  %vm650_vm12 = vcmp.ne.s32.totalorder %v649_v24, 0 }
  0x50   : > { %vm287_vm3 = vcmp.lt.s32.totalorder %v285_v54, 107374182  ;;  %vm288_vm4 = vcmp.lt.s32.totalorder %v286_v55, 107374182  ;;  %vm294_vm5 = vcmp.gt.s32.totalorder %v285_v54, 2040109465  ;;  %v370_v42 = vxor.u32 %v368_v33, %v366_v27 }
  0x51   : > { %v292_v61 = vsel %vm287_vm3, 0.0, %v259_v41  ;;  %v293_v62 = vsel %vm288_vm4, 0.0, %v290_v52  ;;  %vm295_vm6 = vcmp.gt.s32.totalorder %v286_v55, 2040109465  ;;  %v396_v43 = vxor.u32 %v394_v34, %v392_v28  ;;  %vm453_vm3 = vmand %vm451_vm15, %vm452_vm0 }
  0x52   : > { %v296_v0 = vsel %vm294_vm5, 255.0, %v292_v61  ;;  %v297_v2 = vsel %vm295_vm6, 255.0, %v293_v62  ;;  %v371_v46 = vshrl.u32 %v369_v39, 8  ;;  %v397_v47 = vshrl.u32 %v395_v40, 8 }
  0x53   : > { %v625_v5 = vsel %vm902_vm1, %v296_v0, 0  ;;  %v629_v6 = vsel %vm902_vm1, %v297_v2, 0  ;;  %v372_v48 = vshrl.u32 %v370_v42, 8  ;;  %v398_v49 = vshrl.u32 %v396_v43, 8 }
  0x54   : > { %v916_v7 = vsel %vm906_vm2, %v259_v41, %v625_v5  ;;  %v920_v8 = vsel %vm906_vm2, %v290_v52, %v629_v6  ;;  %v373_v50 = vcvt.s32.f32 %v371_v46  ;;  %v399_v51 = vcvt.s32.f32 %v397_v47 }
  0x55   : > { %v312_v10 = vmul.f32 0.003921569, %v916_v7  ;;  %v313_v11 = vmul.f32 0.003921569, %v920_v8  ;;  %v374_v52 = vcvt.s32.f32 %v372_v48  ;;  %v400_v53 = vcvt.s32.f32 %v398_v49 }
  0x56   : > { %v375_v54 = vmul.f32 5.9604645e-08, %v373_v50  ;;  %v401_v55 = vmul.f32 5.9604645e-08, %v399_v51  ;;  %vm327_vm7 = vcmp.gt.f32.partialorder %v916_v7, 0.0  ;;  %vm328_vm8 = vcmp.gt.f32.partialorder %v920_v8, 0.0 }
  0x57   : > { %v314_v15 = vmax.f32 %v312_v10, 1e-12  ;;  %v315_v16 = vmax.f32 %v313_v11, 1e-12  ;;  %v376_v56 = vmul.f32 5.9604645e-08, %v374_v52  ;;  %v402_v57 = vmul.f32 5.9604645e-08, %v400_v53 }
  0x58   : > { %v403_v58 = vadd.f32 %v401_v55, %v375_v54  ;;  %v666_v40 = vstv %s688_s28  ;;  %v789_v48 = vmov 1966171168   ;;  %vm454_vm1 = vcmask 1041409  }
  0x59   : > { %717 = vlog2.f32 %v314_v15  ;;  %v404_v60 = vadd.f32 %v402_v57, %v376_v56  ;;  %vm667_vm14 = vcmp.ne.s32.totalorder %v666_v40, 0  ;;  %v438_v49 = vunpack.c.l.s4 %v789_v48 }
  0x5a   : > { %719 = vlog2.f32 %v315_v16  ;;  %v579_v3 = vadd.f32 -1.0, %v403_v58  ;;  %vm455_vm2 = vsmask.f32 1536 }
  0x5b   : > { %v580_v5 = vadd.f32 -1.0, %v404_v60  ;;  %v439_v53 = vunpack.c.0.s8 %v438_v49  ;;  %vm456_vm4 = vmand %vm454_vm1, %vm455_vm2 }
  0x5c   : > { %v407_v15 = vmul.f32 2.4494896, %v579_v3  ;;  %vm457_vm5 = vmor %vm456_vm4, %vm453_vm3 }
  0x5d   : > { %v408_v17 = vmul.f32 2.4494896, %v580_v5  ;;  %v442_v58 = vsub.s32 %v439_v53, %v874_v1 }
  0x5e   : > { %v409_v22 = vmul.f32 10.0, %v407_v15 }
  0x5f   : > { %v410_v25 = vmul.f32 10.0, %v408_v17 }
  0x60   : > { %v581_v30 = vclamps-f32 %v409_v22, 10.0 }
  0x66   : > { %v718_v31 = vpop.eup %717 }
  0x67   : > { %v720_v35 = vpop.eup %719  ;;  %v317_v36 = vmul.f32 0.6931472, %v718_v31 }
  0x68   : > { %v319_v37 = vmul.f32 0.6931472, %v720_v35 }
  0x69   : > { %v321_v38 = vmul.f32 %v320_v32, %v317_v36 }
  0x6a   : > { %v322_v41 = vmul.f32 %v320_v32, %v319_v37  ;;  %v582_v32 = vclamps-f32 %v410_v25, 10.0 }
  0x6b   : > { %v323_v44 = vmul.f32 1.442695, %v321_v38  ;;  %v657_v38 = vstv %s656_s27 }
  0x6c   : > { %v325_v45 = vmul.f32 1.442695, %v322_v41  ;;  %vm658_vm13 = vcmp.ne.s32.totalorder %v657_v38, 0 }
  0x6d   : > { %721 = vpow2.f32 %v323_v44 }
  0x6e   : > { %723 = vpow2.f32 %v325_v45 }
  0x7a   : > { %v722_v59 = vpop.eup %721 }
  0x7b   : > { %v724_v61 = vpop.eup %723  ;;  %v329_v62 = vsel %vm327_vm7, %v722_v59, 0.0 }
  0x7c   : > { %v330_v63 = vsel %vm328_vm8, %v724_v61, 0.0  ;;  %v331_v0 = vmul.f32 255.0, %v329_v62  ;;  %v458_v61 = vld [vmem:[%s228_s4] sm:$0x3] }
  0x7d   : > { %v332_v2 = vmul.f32 255.0, %v330_v63 }
  0x7e   : > { %v596_v4 = vcvt.f32.s32 %v331_v0  ;;  %v594_v6 = vand.u32 2147483647, %v331_v0  ;;  %v599_v11 = vand.u32 2147483648, %v331_v0 }
  0x7f   : > { %v604_v9 = vcvt.f32.s32 %v332_v2  ;;  %v602_v12 = vand.u32 2147483647, %v332_v2  ;;  %v607_v14 = vand.u32 2147483648, %v332_v2 }
  0x80   : > { %v597_v10 = vcvt.s32.f32 %v596_v4  ;;  %vm595_vm9 = vcmp.lt.f32.partialorder %v594_v6, 8388608.0 }
  0x81   : > { %v605_v13 = vcvt.s32.f32 %v604_v9  ;;  %vm603_vm10 = vcmp.lt.f32.partialorder %v602_v12, 8388608.0 }
  0x82   : > { %v598_v16 = vand.u32 2147483647, %v597_v10 }
  0x83   : > { %v606_v18 = vand.u32 2147483647, %v605_v13 }
  0x84   : > { %v600_v19 = vor.u32 %v599_v11, %v598_v16 }
  0x85   : > { %v608_v20 = vor.u32 %v607_v14, %v606_v18 }
  0x86   : > { %v601_v23 = vsel %vm595_vm9, %v600_v19, %v331_v0 }
  0x87   : > { %v609_v26 = vsel %vm603_vm10, %v608_v20, %v332_v2  ;;  %v335_v27 = vmax.f32 %v601_v23, 0.0 }
  0x88   : > { %v336_v28 = vmax.f32 %v609_v26, 0.0 }
  0x89   : > { %v337_v29 = vmin.f32 %v335_v27, 255.0 }
  0x8a   : > { %v338_v31 = vmin.f32 %v336_v28, 255.0 }
  0x8b   : > { %v642_v33 = vsel %vm641_vm11, %v337_v29, 0 }
  0x8c   : > { %v646_v34 = vsel %vm641_vm11, %v338_v31, 0  ;;  %v651_v35 = vsel %vm650_vm12, %v916_v7, %v642_v33 }
  0x8d   : > { %v655_v36 = vsel %vm650_vm12, %v920_v8, %v646_v34  ;;  %v415_v37 = vadd.f32 %v651_v35, %v581_v30 }
  0x8e   : > { %v416_v39 = vadd.f32 %v655_v36, %v582_v32 }
  0x8f   : > { %v417_v41 = vmax.f32 %v415_v37, 0.0 }
  0x90   : > { %v418_v42 = vmax.f32 %v416_v39, 0.0 }
  0x91   : > { %v419_v43 = vmin.f32 %v417_v41, 255.0 }
  0x92   : > { %v420_v44 = vmin.f32 %v418_v42, 255.0 }
  0x93   : > { %v659_v45 = vsel %vm658_vm13, %v419_v43, 0 }
  0x94   : > { %v663_v46 = vsel %vm658_vm13, %v420_v44, 0  ;;  %v668_v47 = vsel %vm667_vm14, %v651_v35, %v659_v45 }
  0x95   : > { %v672_v50 = vsel %vm667_vm14, %v655_v36, %v663_v46  ;;  %v428_v7 = vfloor.f32 %v668_v47 }
  0x96   : > { %v429_v51 = vfloor.f32 %v672_v50 }
  0x97   : > { %v610_v8 = vtrunc.f32 %v428_v7 }
  0x98   : > { %v612_v52 = vtrunc.f32 %v429_v51 }
  0x99   : > { %v611_v54 = vcvt.f32.s32 %v610_v8 }
  0x9a   : > { %v613_v55 = vcvt.f32.s32 %v612_v52 }
  0x9b   : > { %v432_v56 = vpack.c.b16 %v611_v54, %v611_v54 }
  0x9c   : > { %v434_v57 = vpack.c.b16 %v613_v55, %v613_v55 }
  0x9e   : > { %v583_v59 = vpack.c.b8 %v434_v57, %v432_v56 }
  0xa0   : > { %v443_v60 = vrot.slane %v583_v59, %v442_v58 }
  0xa2   : > { %v450_v62 = vrot.slane %v443_v60, %v442_v58 }
  0xa4   : > { %v459_v63 = vsel %vm457_vm5, %v450_v62, %v458_v61 }
  0xa5   : > { %460 = vst [vmem:[%s228_s4] sm:$0x3] %v459_v63 }
  0xa6 PF: > { %s15_s14 = sadd.s32 1, %s785_s14   ;;  %s968_s12 = smov %s781_s13 }
  0xa7   : > { %p12_p12 = scmp.ge.s32.totalorder %s15_s14, 4   ;;  %s969_s13 = smov %s971_s16 }
  0xa9   :  { %14 = sbr.rel (!%p12_p12) target bundleno = 3 (0x3), region = 95 }
  0xae   :  { %488 = vsyncpa [#allocation3], 1 }
  0xaf   :  { %490 = vsyncpa [#allocation3 + $0x1], 1 }
  0xb0   :  { %491 = vsyncpa [#allocation5], 1 }

// kernel: custom-call.11
= control target key start
LH: loop header
LB: loop body
LE: loop exit
PB: predicated region body
PF: predicated region fallthrough
CT: control target
= control target key end

     0   :  { %5 = vsyncpa [#allocation6], 0  ;;  %s909_s0 = inlined_call_operand.vmem [shape: f32[2,3,3], index: 0, kind: input, shape index: {}]   ;;  %s910_s1 = inlined_call_operand.vmem [shape: f32[2,3,3], index: 1, kind: output, shape index: {0}]   ;;  %s911_s2 = inlined_call_operand.hbm [shape: s32[2,3], index: 2, kind: output, shape index: {1}]   ;;  %s912_s3 = inlined_call_operand.vmem [shape: s32[2,3], index: 3, kind: output, shape index: {2}]  }
   0x1   :  { %7 = vsyncpa [#allocation6 + $0x1], 0  ;;  %s726_s12 = smov 0   ;;  %s728_s13 = smov 0  }
   0x2   :  { %s730_s14 = smov 0   ;;  %s732_s15 = smov 0  }
   0x3 LB: > { %s747_s16 = sadd.s32 4294967295, %s698_s15   ;;  %s563_s17 = sadd.s32 4294967294, %s698_s15   ;;  %s698_s15 = sphi %s732_s15, %s920_s15   ;;  %s694_s14 = sphi %s730_s14, %s919_s14   ;;  %s690_s13 = sphi %s728_s13, %s918_s13   ;;  %s686_s12 = sphi %s726_s12, %s917_s12  }
   0x4   : > { %s751_s18 = sadd.s32 1, %s698_s15   ;;  %s17_s19 = sshrl.u32 %s698_s15, 3 }
   0x5   : > { %s18_s20 = sshrl.u32 %s751_s18, 3  ;;  %s22_s21 = sadd.s32 1, %s694_s14 }
   0x6   : > { %s19_s22 = ssub.s32 %s17_s19, %s18_s20  ;;  %p32_p0 = scmp.ne.s32.totalorder %s694_s14, %s690_s13 }
   0x7   : > { %p20_p1 = scmp.eq.s32.totalorder %s19_s22, 0  ;;  %p33_p2 = scmp.eq.s32.totalorder %s747_s16, 1 }
   0x8   : > { %p38_p3 = scmp.ne.s32.totalorder %s690_s13, %s686_s12  ;;  %p39_p4 = scmp.eq.s32.totalorder %s563_s17, 1 }
   0x9   : > { %s762_s23 = scalar_select %p20_p1, %s694_s14, %s22_s21  }
   0xa   : > { %p764_p5 = por %p33_p2, %p32_p0  ;;  %p768_p6 = por %p39_p4, %p38_p3 }
   0xb   : > { %p565_p7 = scmp.ge.s32.totalorder %s698_s15, 2 }
   0xc   : > { %s85_s26 = sand.u32 (!%p565_p7), 1, %s698_s15   ;;  %s567_s27 = sshll.u32 (!%p565_p7), %s698_s15, 2 }
   0xd   : > { %83 = sbr.rel (%p565_p7) target bundleno = 20 (0x14), region = 16  ;;  %s566_s28 = sshll.u32 (!%p565_p7), %s85_s26, 2 }
   0xe   : > { %s89_s4 = scalar_lea.vmem (!%p565_p7), %s909_s0, %s567_s27  ;;  %s87_s5 = scalar_lea.vmem (!%p565_p7), [#allocation1], %s566_s28 }
  0x12   : > { %v106_v0 = vld [vmem:[%s89_s4] sm:$0xf] }
  0x13   : > { %107 = vst [vmem:[%s87_s5] sm:$0xf] %v106_v0 }
  0x14 PF: > { %p568_p8 = scmp.ge.s32.totalorder %s698_s15, 1  ;;  %p124_p9 = scmp.lt.s32.totalorder %s698_s15, 3 }
  0x16   : > { %p125_p10 = pnand %p568_p8, %p124_p9 }
  0x18   : > { %128 = sbr.rel (%p125_p10) target bundleno = 446 (0x1be), region = 50 }
  0x1d   : > { %s135_s6 = sand.u32 1, %s747_s16   ;;  %s146_s7 = sand.u32 1, %s690_s13   ;;  %v169_v1 = vlaneseq  ;;  %v704_v4 = vmov 0  }
  0x1e   : > { %s784_s8 = sshll.u32 %s135_s6, 2  ;;  %s788_s9 = sshll.u32 %s146_s7, 1 }
  0x1f   : > { %v791_v2 = vshrl.u32 %v169_v1, 7  ;;  %s137_s10 = scalar_lea.vmem [#allocation1], %s784_s8  ;;  %s164_s11 = sand.u32 7, %s747_s16  }
  0x20   : > { %v158_v3 = vld [vmem:[%s137_s10] sm:$0xf]  ;;  %s796_s17 = scalar_lea.vmem [#allocation4], %s164_s11  ;;  %s141_s19 = scalar_lea.vmem [#allocation3], %s784_s8 }
  0x21   : > { %159 = vst [vmem:[#allocation0] sm:$0xf] %v158_v3  ;;  %173 = vst [vmem:[#allocation9] sm:$0xff] %v791_v2  ;;  %s148_s20 = scalar_lea.vmem [#allocation5], %s788_s9  ;;  %s154_s21 = scalar_lea.vmem [#allocation8], %s788_s9 }
  0x22   : > { %168 = vst [vmem:[%s796_s17] sm:$0x1] %v704_v4  ;;  %s802_s22 = scalar_lea.vmem [#allocation7], %s164_s11  ;;  %s804_s26 = smov 0  }
  0x28   : > { %v162_v5 = vld [vmem:[#allocation0] sm:$0xff] }
  0x29   : > { %163 = vst [vmem:[#allocation2] sm:$0xff] %v162_v5 }
  0x2a LB: >> { %vm189_vm0 = vcmp.lt.s32.totalorder %v791_v2, 3  ;;  %v811_v8 = vstv %s702_s26  ;;  %s230_s27 = ssub.s32 128, %s702_s26  ;;  %v236_v38 = vand.u32 127, %v169_v1  ;;  %v239_v40 = vld [vmem:[%s796_s17] ss:$0 sm:$0xff]  ;;  %s242_s28 = scalar_lea.vmem [#allocation2], %s702_s26  ;;  %s702_s26 = sphi %s804_s26, %s179_s26  }
  0x2b   : >> { %vm188_vm1 = vcmp.ge.s32.totalorder %v791_v2, %v811_v8  ;;  %s248_s30 = scalar_lea.vmem [#allocation9], %s702_s26  ;;  %vm268_vm15 = vcmp.gt.s32.totalorder %v791_v2, %v811_v8  ;;  %s179_s26 = sadd.s32 1, %s702_s26  }
  0x2c   : >> { %vm190_vm3 = vmand %vm188_vm1, %vm189_vm0  ;;  %vm260_vm12 = vcmp.gt.s32.totalorder %v236_v38, %v811_v8  ;;  %vm237_vm13 = vcmp.eq.s32.totalorder %v236_v38, %v811_v8  ;;  %v250_v42 = vld [vmem:[%s248_s30] ss:$0 sm:$0xff]  ;;  %p176_p11 = scmp.ge.s32.totalorder %s179_s26, 3  }
  0x2d   : >> { %vm272_vm1 = vmand %vm268_vm15, %vm237_vm13  ;;  %s913_s6 = sshrl.u32 (%p176_p11), %s747_s16, 3  ;;  %s577_s10 = sshll.u32 (%p176_p11), %s747_s16, 2 }
  0x2e   : > { %s578_s11 = sshll.u32 (%p176_p11), %s913_s6, 5 }
  0x30   : >> { %v184_v6 = vld [vmem:[#allocation2] sm:$0xff]  ;;  %v244_v41 = vld [vmem:[%s242_s28] ss:$0 sm:$0xff] }
  0x31   : >> { %v185_v7 = vand.u32 2147483647, %v184_v6 }
  0x33   : >> { %vm573_vm2 = vcmp.gt.f32.partialorder %v185_v7, -inf }
  0x34   : >> { %vm192_vm4 = vmand %vm190_vm3, %vm573_vm2 }
  0x35   : >> { %v193_v9 = vsel %vm192_vm4, %v791_v2, %v811_v8  ;;  %v194_v10 = vsel %vm192_vm4, %v185_v7, -inf }
  0x36   : >> { %v195_v11 = vrot.slane %v194_v10, 1  ;;  %v196_v12 = vrot.slane %v193_v9, 1 }
  0x38   : >> { %vm197_vm5 = vcmp.ge.f32.partialorder %v195_v11, %v194_v10  ;;  %v200_v13 = vrot.slane %v195_v11, 1  ;;  %v201_v14 = vrot.slane %v196_v12, 1 }
  0x39   : >> { %v198_v15 = vsel %vm197_vm5, %v195_v11, %v194_v10  ;;  %v199_v16 = vsel %vm197_vm5, %v196_v12, %v193_v9 }
  0x3a   : >> { %vm202_vm6 = vcmp.ge.f32.partialorder %v200_v13, %v198_v15  ;;  %v205_v17 = vrot.slane %v200_v13, 1  ;;  %v206_v18 = vrot.slane %v201_v14, 1 }
  0x3b   : >> { %v203_v19 = vsel %vm202_vm6, %v200_v13, %v198_v15  ;;  %v204_v20 = vsel %vm202_vm6, %v201_v14, %v199_v16 }
  0x3c   : >> { %vm207_vm7 = vcmp.ge.f32.partialorder %v205_v17, %v203_v19  ;;  %v210_v21 = vrot.slane %v205_v17, 1  ;;  %v211_v22 = vrot.slane %v206_v18, 1 }
  0x3d   : >> { %v208_v23 = vsel %vm207_vm7, %v205_v17, %v203_v19  ;;  %v209_v24 = vsel %vm207_vm7, %v206_v18, %v204_v20 }
  0x3e   : >> { %vm212_vm8 = vcmp.ge.f32.partialorder %v210_v21, %v208_v23  ;;  %v215_v25 = vrot.slane %v210_v21, 1  ;;  %v216_v26 = vrot.slane %v211_v22, 1 }
  0x3f   : >> { %v213_v27 = vsel %vm212_vm8, %v210_v21, %v208_v23  ;;  %v214_v28 = vsel %vm212_vm8, %v211_v22, %v209_v24 }
  0x40   : >> { %vm217_vm9 = vcmp.ge.f32.partialorder %v215_v25, %v213_v27  ;;  %v220_v29 = vrot.slane %v215_v25, 1  ;;  %v221_v30 = vrot.slane %v216_v26, 1 }
  0x41   : >> { %v218_v31 = vsel %vm217_vm9, %v215_v25, %v213_v27  ;;  %v219_v32 = vsel %vm217_vm9, %v216_v26, %v214_v28 }
  0x42   : >> { %vm222_vm10 = vcmp.ge.f32.partialorder %v220_v29, %v218_v31  ;;  %v225_v33 = vrot.slane %v220_v29, 1  ;;  %v226_v34 = vrot.slane %v221_v30, 1 }
  0x43   : >> { %v223_v35 = vsel %vm222_vm10, %v220_v29, %v218_v31  ;;  %v224_v36 = vsel %vm222_vm10, %v221_v30, %v219_v32 }
  0x44   : >> { %vm227_vm11 = vcmp.ge.f32.partialorder %v225_v33, %v223_v35 }
  0x45   : >> { %v229_v37 = vsel %vm227_vm11, %v226_v34, %v224_v36 }
  0x46   : >> { %231 = vrot.lane.b32.xlu0 %v229_v37, %s230_s27  ;;  %s849_s27 = scalar_lea.vmem (%p176_p11), %s910_s1, %s577_s10 }
  0xb8   : >> { %v232_v39 = vpop.permute.xlu0 %231 }
  0xb9   : >> { %582 = vpush %v232_v39 }
  0xea   : >> { %s583_s29 = spop %582 }
  0xeb   : >> { %v238_v43 = vstv %s583_s29  ;;  %s243_s4 = scalar_lea.vmem [#allocation2], %s583_s29  ;;  %s249_s5 = scalar_lea.vmem [#allocation9], %s583_s29 }
  0xec   : >> { %v245_v44 = vld [vmem:[%s243_s4] ss:$0 sm:$0xff]  ;;  %v240_v46 = vsel %vm237_vm13, %v238_v43, %v239_v40 }
  0xed   : >> { %v251_v45 = vld [vmem:[%s249_s5] ss:$0 sm:$0xff]  ;;  %246 = vst [vmem:[%s243_s4] sm:$0x1] %v244_v41  ;;  %vm254_vm14 = vcmp.ne.f32.partialorder %v245_v44, 0.0  ;;  %241 = vst [vmem:[%s796_s17] sm:$0x1] %v240_v46  ;;  %v261_v53 = vsel %vm260_vm12, %v245_v44, 0.0 }
  0xee   : >> { %252 = vst [vmem:[%s249_s5] sm:$0x1] %v250_v42  ;;  %247 = vst [vmem:[%s242_s28] sm:$0x1] %v245_v44  ;;  %s410_s4 = sshll.u32 (%p176_p11), %s148_s20, 4  ;;  %s357_s5 = scalar_lea.sflag (%p176_p11), [#allocation6], %s146_s7  ;;  %s411_s4 = int_to_ptr.vmem [resolvable:$true] %s410_s4 }
  0xef   : >> { %253 = vst [vmem:[%s248_s30] sm:$0x1] %v251_v45  ;;  %vm255_vm0 = vmand %vm237_vm13, %vm254_vm14  ;;  %s854_s30 = scalar_lea.hbm (%p176_p11), %s911_s2, %s578_s11  ;;  %s634_s6 = scalar_lea.vmem (%p176_p11), %s411_s4, 32 }
  0xf0   : >> { %v256_v47 = vsel %vm255_vm0, %v245_v44, 1.0  ;;  %p635_p12 = scmp.ne.s32.totalorder (%p176_p11), %s411_s4, %s634_s6  ;;  %s705_s17 = smov (%p176_p11), [#allocation5]  }
  0xf1   : >> { %v269_v48 = vsel %vm268_vm15, %v256_v47, 1.0  ;;  %s638_s10 = sshll.u32 (%p176_p11), %s705_s17, 4  ;;  %s639_s10 = int_to_ptr.vmem [resolvable:$false] %s638_s10 }
  0xf2   : >> { %632 = vrcp.f32 %v269_v48  ;;  %p636_p13 = pnand (%p176_p11), %p635_p12, %p764_p5  ;;  %s640_s26 = scalar_lea.vmem (%p176_p11), %s639_s10, 64 }
  0xf3   : > { %p641_p1 = scmp.lt.s32.totalorder (%p176_p11), %s411_s4, %s639_s10  ;;  %p642_p2 = scmp.lt.s32.totalorder (%p176_p11), %s640_s26, %s634_s6 }
  0xf4   : > { %v340_v59 = vld [vmem:[#allocation4] sm:$0x3] (%p176_p11)  ;;  %p637_p0 = pneg (%p176_p11), %p636_p13 }
  0xf5   : >> { %v265_v50 = vld [vmem:[#allocation2] sm:$0xff]  ;;  %343 = vst [vmem:[%s148_s20] sm:$0x3] (%p176_p11), %v340_v59  ;;  %p643_p3 = por (%p176_p11), %p642_p2, %p641_p1 }
  0xf6   : > { %v279_v57 = vld [vmem:[#allocation9] sm:$0xff] (%p176_p11) }
  0xf7   : > { %p644_p4 = pnand (%p176_p11), %p643_p3, %p637_p0 }
  0xff   : >> { %v633_v49 = vpop.eup %632 }
 0x100   : >> { %v271_v51 = vmul.f32 %v633_v49, %v265_v50 }
 0x102   : >> { %v273_v52 = vsel %vm272_vm1, %v271_v51, 0.0 }
 0x103   : >> { %274 = vadd.xlane.f32.xlu0 %v273_v52 }
 0x130   : > { %295 = vxpose.xlu0.b32.start.end [1/1] (short) (narrow) (%p176_p11), %v279_v57, 8 }
 0x18c   : >> { %v275_v54 = vpop.xlane.xlu0 %274 }
 0x18d   : >> { %v276_v55 = vmul.f32 %v275_v54, %v261_v53  ;;  %178 = sbr.rel (!%p176_p11) target bundleno = 42 (0x2a), region = 202 }
 0x18f   : >> { %v277_v56 = vsub.f32 %v271_v51, %v276_v55 }
 0x191   : >> { %278 = vst [vmem:[#allocation2] sm:$0xff] %v277_v56 }
 0x198   : > { %v332_v58 = vld [vmem:[#allocation2] sm:$0xf] }
 0x199   : > { %335 = vst [vmem:[%s141_s19] sm:$0xf] %v332_v58 }
 0x1a0   : > { %v383_v60 = vld [vmem:[%s141_s19] sm:$0xf] }
 0x1a1   : > { %647 = shalt.err (!%p644_p4)
}
 0x1a2   : > { %s648_s8 = scalar_lea.hbm %s854_s30, 32  ;;  %s652_s20 = scalar_lea.hbm %s911_s2, 32 }
 0x1a3   : > { %p649_p8 = scmp.ne.s32.totalorder %s854_s30, %s648_s8  ;;  %p653_p11 = scmp.lt.s32.totalorder %s854_s30, %s911_s2 }
 0x1a4   : > { %p654_p12 = scmp.lt.s32.totalorder %s652_s20, %s648_s8 }
 0x1a5   : > { %p650_p9 = pnand %p649_p8, %p764_p5 }
 0x1a6   : > { %p655_p13 = por %p654_p12, %p653_p11 }
 0x1a7   : > { %p651_p10 = pneg %p650_p9 }
 0x1a9   : > { %p656_p0 = pnand %p655_p13, %p651_p10 }
 0x1ab   : > { %659 = shalt.err (!%p656_p0)
}
 0x1ac   : > { %584 = dma.vmem_to_hbm [thread:$0]  (%p764_p5), %s411_s4, 32, %s854_s30, %s357_s5   ;;  %384 = vst [vmem:[%s849_s27] sm:$0xf] %v383_v60  ;;  %v311_v61 = vpop.trf.xlu0 }
 0x1ad   : > { %327 = vst [vmem:[%s802_s22] sm:$0x1] %v311_v61  ;;  %s916_s6 = sshrl.u32 (%p764_p5), %s747_s16, 3 }
 0x1ae   : > { %s579_s29 = sshll.u32 (%p764_p5), %s916_s6, 1 }
 0x1af   : > { %s419_s26 = scalar_lea.vmem (%p764_p5), %s912_s3, %s579_s29 }
 0x1b1   : > { %416 = sbr.rel (!%p764_p5) target bundleno = 446 (0x1be), region = 96 }
 0x1b4   : > { %v348_v62 = vld [vmem:[#allocation7] sm:$0x3] }
 0x1b5   : > { %351 = vst [vmem:[%s154_s21] sm:$0x3] %v348_v62 }
 0x1bc   : > { %v436_v63 = vld [vmem:[%s154_s21] sm:$0x3] }
 0x1bd   : > { %437 = vst [vmem:[%s419_s26] sm:$0x3] %v436_v63 }
 0x1be PF: > { %s465_s22 = sand.u32 1, %s686_s12   ;;  %p587_p5 = pnand %p565_p7, %p768_p6 }
 0x1bf   : > { %s466_s16 = scalar_lea.sflag [#allocation6], %s465_s22 }
 0x1c0   : > { %p588_p1 = pneg %p587_p5 }
 0x1c2   : > { %681 = dma.done.wait (%p588_p1), %s466_s16, 32  }
 0x1c3   : > { %683 = vsyncadd (%p588_p1), %s466_s16, 4294967264  ;;  %p10_p2 = scmp.ge.s32.totalorder %s751_s18, 4   ;;  %s917_s12 = smov %s690_s13 }
 0x1c4   : > { %s918_s13 = smov %s694_s14  ;;  %s919_s14 = smov %s762_s23 }
 0x1c5   : > { %s920_s15 = smov %s751_s18  ;;  %12 = sbr.rel (!%p10_p2) target bundleno = 3 (0x3), region = 213 }
 0x1ca   :  { %478 = vsyncpa [#allocation6], 1 }
 0x1cb   :  { %480 = vsyncpa [#allocation6 + $0x1], 1 }

// kernel: augmentor_forward.5
= control target key start
LH: loop header
LB: loop body
LE: loop exit
PB: predicated region body
PF: predicated region fallthrough
CT: control target
= control target key end

     0   :  { %11 = vsyncpa [#allocation3], 0  ;;  %s636_s18 = smov 0   ;;  %s696_s0 = inlined_call_operand.vmem [shape: s32[2], index: 0, kind: input, shape index: {}]   ;;  %s697_s1 = inlined_call_operand.vmem [shape: bf16[16,16], index: 1, kind: input, shape index: {}]   ;;  %s698_s2 = inlined_call_operand.vmem [shape: bf16[16,16], index: 2, kind: input, shape index: {}]   ;;  %s699_s3 = inlined_call_operand.vmem [shape: bf16[2,16,16], index: 3, kind: output, shape index: {0}]   ;;  %s700_s4 = inlined_call_operand.vmem [shape: f32[2,1,16], index: 4, kind: output, shape index: {1}]   ;;  %s701_s5 = inlined_call_operand.vmem [shape: f32[2,1,16], index: 5, kind: output, shape index: {2}]  }
   0x1 LB: > { %s642_s19 = sadd.s32 4294967295, %s601_s18   ;;  %p520_p0 = scmp.ge.s32.totalorder %s601_s18, 1  ;;  %s601_s18 = sphi %s636_s18, %s17_s18  }
   0x2   : > { %p163_p1 = scmp.lt.s32.totalorder %s601_s18, 3  ;;  %s176_s22 = sshll.u32 %s696_s0, 4  ;;  %s177_s22 = int_to_ptr.vmem [resolvable:$true] %s176_s22 }
   0x3   : > { %p561_p3 = scmp.eq.s32.totalorder %s642_s19, 0  ;;  %s576_s24 = scalar_lea.vmem %s177_s22, 16 }
   0x4   : > { %p649_p2 = pnand %p520_p0, %p163_p1  ;;  %p577_p6 = scmp.ne.s32.totalorder %s177_s22, %s576_s24 }
   0x5   : > { %p584_p10 = scmp.lt.s32.totalorder %s177_s22, %s177_s22  ;;  %p585_p11 = scmp.lt.s32.totalorder %s576_s24, %s576_s24 }
   0x6   : > { %p557_p4 = pneg %p649_p2 }
   0x7   : > { %p586_p12 = por %p585_p11, %p584_p10 }
   0x8   : > { %p558_p5 = pnand %p561_p3, %p557_p4 }
   0xa   : > { %p578_p7 = pneg %p558_p5 }
   0xc   : > { %p579_p8 = pnand %p578_p7, %p577_p6 }
   0xe   : > { %p580_p9 = pneg %p579_p8 }
  0x10   : > { %p587_p13 = pnand %p586_p12, %p580_p9 }
  0x12   : > { %590 = shalt.err (!%p587_p13)
}
  0x13   : > { %s603_s25 = smov [#allocation2]   ;;  %195 = sbr.rel (%p649_p2) target bundleno = 480 (0x1e0), region = 32 }
  0x14   : > { %560 = dma.vmem_to_smem (!%p558_p5), %s177_s22, 16, %s603_s25, [#allocation3]  }
  0x18   : > { %596 = dma.done.wait (%p561_p3), [#allocation3], 16  }
  0x19   : > { %598 = vsyncadd (%p561_p3), [#allocation3], 4294967280 }
  0x1a   : > { %201 = sfence }
  0x1b   : > { %v574_v0 = vld [vmem:[%s698_s2] sm:$0xff]   ;;  %v238_v1 = vlaneseq  ;;  %v604_v2 = vmov 0.0   ;;  %s237_s28 = sld [smem:[#allocation2 + %s642_s19]]  ;;  %vm605_vm0 = vmmov 0   ;;  %vm284_vm1 = vcmask 130048   ;;  %p225_p0 = scmp.lt.s32.totalorder %s642_s19, 1 }
  0x1c   : > { %541 = vmatprep.subr.bf16.mxu0 %v604_v2  ;;  %547 = vmatprep.subr.bf16.mxu1 %v604_v2  ;;  %v575_v43 = vld [vmem:[%s697_s1] sm:$0xff]   ;;  %vm389_vm2 = vcmask 125952   ;;  %vm401_vm3 = vcmask 122880  }
  0x1d   : > { %542 = vmatpush3.bf16.msra.mxu0 %v574_v0  ;;  %543 = vmatprep.mubr.msk.bf16.mxu0 %vm605_vm0, %v604_v2  ;;  %v239_v3 = vshrl.u32 %v238_v1, 7  ;;  %v242_v4 = vand.u32 127, %v238_v1  ;;  %s704_s19 = smov (!%p225_p0, %s642_s19), 1 }
  0x1e   : > { %549 = vmatprep.mubr.msk.bf16.mxu1 %vm605_vm0, %v604_v2  ;;  %s534_s7 = sshll.u32 %s704_s19, 3  ;;  %s232_s13 = scalar_lea.vmem %s700_s4, %s704_s19 }
  0x1f   : > { %v240_v5 = vadd.s32 8, %v239_v3  ;;  %v243_v6 = vmul.u32 16, %v239_v3  ;;  %s229_s10 = scalar_lea.vmem %s699_s3, %s534_s7  ;;  %s235_s16 = scalar_lea.vmem %s701_s5, %s704_s19 }
  0x21   : > { %v244_v7 = vmul.u32 16, %v240_v5  ;;  %v245_v8 = vadd.s32 %v243_v6, %v242_v4  ;;  %s249_s29 = sxor.u32 608135816, %s237_s28 }
  0x22   : > { %v250_v11 = vstv %s249_s29 }
  0x23   : > { %v246_v9 = vadd.s32 %v244_v7, %v242_v4  ;;  %v247_v10 = vmul.u32 2654435761, %v245_v8 }
  0x25   : > { %v248_v12 = vmul.u32 2654435761, %v246_v9  ;;  %v251_v13 = vadd.s32 %v250_v11, %v247_v10 }
  0x27   : > { %v252_v14 = vadd.s32 %v250_v11, %v248_v12  ;;  %v253_v15 = vshrl.u32 %v251_v13, 15 }
  0x29   : > { %v254_v16 = vshrl.u32 %v252_v14, 15  ;;  %v255_v17 = vxor.u32 %v253_v15, %v251_v13 }
  0x2b   : > { %v256_v18 = vxor.u32 %v254_v16, %v252_v14  ;;  %v257_v19 = vmul.u32 2246822507, %v255_v17 }
  0x2d   : > { %v258_v20 = vmul.u32 2246822507, %v256_v18  ;;  %v259_v21 = vshrl.u32 %v257_v19, 13 }
  0x2f   : > { %v260_v22 = vshrl.u32 %v258_v20, 13  ;;  %v261_v23 = vxor.u32 %v259_v21, %v257_v19 }
  0x31   : > { %v262_v24 = vxor.u32 %v260_v22, %v258_v20  ;;  %v263_v25 = vmul.u32 3266489909, %v261_v23 }
  0x33   : > { %v264_v26 = vmul.u32 3266489909, %v262_v24  ;;  %v265_v27 = vshrl.u32 %v263_v25, 16 }
  0x35   : > { %v266_v28 = vshrl.u32 %v264_v26, 16  ;;  %v267_v29 = vxor.u32 %v265_v27, %v263_v25 }
  0x37   : > { %v268_v30 = vxor.u32 %v266_v28, %v264_v26  ;;  %v269_v31 = vshrl.u32 %v267_v29, 8 }
  0x39   : > { %v270_v32 = vshrl.u32 %v268_v30, 8  ;;  %v271_v33 = vcvt.s32.f32 %v269_v31 }
  0x3b   : > { %v272_v34 = vcvt.s32.f32 %v270_v32  ;;  %v273_v35 = vmul.f32 5.9604645e-08, %v271_v33 }
  0x3d   : > { %v274_v36 = vmul.f32 5.9604645e-08, %v272_v34 }
  0x3f   : > { %v275_v37 = vpack.c.bf16 %v274_v36, %v273_v35 }
  0x41   : > { %544 = vmatmul.mubr.msk.bf16.vlgmr.msra.gmra.mxu0 %vm284_vm1, %v275_v37 }
 0x101   : > { %v322_v38 = vpop.f32.mrf.mxu0 }
 0x103   : > { %v545_v39 = vpop.f32.mrf.mxu0 }
 0x105   : > { %v325_v40 = vpop.f32.mrf.mxu0 }
 0x106   : > { %v331_v41 = vpack.c.bf16 %v325_v40, %v322_v38 }
 0x107   : > { %v546_v42 = vpop.f32.mrf.mxu0 }
 0x108   : > { %548 = vmatpush3.bf16.msra.mxu1 %v331_v41 }
 0x10b   : > { %550 = vmatmul.mubr.msk.bf16.vlgmr.msra.gmra.mxu1 %vm284_vm1, %v575_v43 }
 0x1cb   : > { %v374_v44 = vpop.f32.mrf.mxu1 }
 0x1cc   : > { %v535_v45 = vpack.c.bf16 %v374_v44, %v374_v44  ;;  %v392_v47 = vsel %vm284_vm1, %v374_v44, inf  ;;  %v403_v49 = vsel %vm284_vm1, %v374_v44, -inf }
 0x1cd   : > { %v551_v46 = vpop.f32.mrf.mxu1 }
 0x1ce   : > { %390 = vst.msk [vmem:[%s229_s10] sm:$0xf] %vm389_vm2, %v535_v45 }
 0x1cf   : > { %v377_v48 = vpop.f32.mrf.mxu1 }
 0x1d0   : > { %v536_v50 = vpack.c.bf16 %v377_v48, %v377_v48  ;;  %v393_v51 = vsel %vm284_vm1, %v377_v48, inf  ;;  %v404_v52 = vsel %vm284_vm1, %v377_v48, -inf }
 0x1d1   : > { %v394_v53 = vmin.f32 %v392_v47, %v393_v51  ;;  %v405_v54 = vmax.f32 %v403_v49, %v404_v52  ;;  %v552_v55 = vpop.f32.mrf.mxu1 }
 0x1d2   : > { %391 = vst.msk [vmem:[%s229_s10 + $0x4] sm:$0xf] %vm389_vm2, %v536_v50 }
 0x1d3   : > { %v395_v56 = vrot.slane %v394_v53, 4  ;;  %v406_v57 = vrot.slane %v405_v54, 4 }
 0x1d5   : > { %v396_v58 = vmin.f32 %v394_v53, %v395_v56  ;;  %v407_v59 = vmax.f32 %v405_v54, %v406_v57 }
 0x1d7   : > { %v397_v60 = vrot.slane %v396_v58, 2  ;;  %v408_v61 = vrot.slane %v407_v59, 2 }
 0x1d9   : > { %v398_v62 = vmin.f32 %v396_v58, %v397_v60  ;;  %v409_v63 = vmax.f32 %v407_v59, %v408_v61 }
 0x1db   : > { %v399_v0 = vrot.slane %v398_v62, 1  ;;  %v410_v1 = vrot.slane %v409_v63, 1 }
 0x1dd   : > { %v400_v2 = vmin.f32 %v398_v62, %v399_v0  ;;  %v411_v3 = vmax.f32 %v409_v63, %v410_v1 }
 0x1df   : > { %402 = vst.msk [vmem:[%s232_s13] sm:$0x1] %vm401_vm3, %v400_v2  ;;  %412 = vst.msk [vmem:[%s235_s16] sm:$0x1] %vm401_vm3, %v411_v3 }
 0x1e0 PF: > { %s17_s18 = sadd.s32 1, %s601_s18  }
 0x1e1   : > { %p14_p1 = scmp.ge.s32.totalorder %s17_s18, 4  }
 0x1e3   :  { %16 = sbr.rel (!%p14_p1) target bundleno = 1 (0x1), region = 88 }
 0x1e8   :  { %458 = vsyncpa [#allocation3], 1 }
 0x1e9   :  { %460 = vsyncpa [#allocation3 + $0x1], 1 }

// kernel: custom-call.13
= control target key start
LH: loop header
LB: loop body
LE: loop exit
PB: predicated region body
PF: predicated region fallthrough
CT: control target
= control target key end

     0   :  { %s350_s6 = smov 0   ;;  %s352_s7 = smov 0   ;;  %s397_s0 = inlined_call_operand.vmem [shape: f32[2,1,3,3], index: 0, kind: input, shape index: {}]   ;;  %s398_s1 = inlined_call_operand.vmem [shape: f32[2,1,3,3], index: 1, kind: output, shape index: {}]  }
   0x1   :  { %s354_s8 = smov 0  }
   0x2 LB: > { %s276_s9 = sadd.s32 4294967295, %s337_s8   ;;  %s33_s10 = sadd.s32 1, %s333_s7  ;;  %s337_s8 = sphi %s354_s8, %s7_s8   ;;  %s333_s7 = sphi %s352_s7, %s400_s7   ;;  %s329_s6 = sphi %s350_s6, %s399_s6  }
   0x3   : > { %p35_p0 = scmp.ge.s32.totalorder %s33_s10, 2  ;;  %p278_p1 = scmp.ge.s32.totalorder %s337_s8, 2 }
   0x4   : > { %s49_s11 = sand.u32 (!%p278_p1), 1, %s337_s8   ;;  %s280_s12 = sshll.u32 (!%p278_p1), %s333_s7, 2 }
   0x5   : > { %s402_s10 = smov (%p35_p0, %s33_s10), 0  ;;  %47 = sbr.rel (%p278_p1) target bundleno = 12 (0xc), region = 16 }
   0x6   : > { %s279_s13 = sshll.u32 (!%p278_p1), %s49_s11, 2  ;;  %s56_s16 = scalar_lea.vmem (!%p278_p1), %s397_s0, %s280_s12 }
   0x7   : > { %s51_s17 = scalar_lea.vmem (!%p278_p1), [#allocation1], %s279_s13 }
   0xa   : > { %v73_v0 = vld [vmem:[%s56_s16] sm:$0xf] }
   0xb   : > { %74 = vst [vmem:[%s51_s17] sm:$0xf] %v73_v0 }
   0xc PF: > { %p281_p2 = scmp.ge.s32.totalorder %s337_s8, 1  ;;  %p91_p3 = scmp.lt.s32.totalorder %s337_s8, 3 }
   0xe   : > { %p92_p4 = pnand %p281_p2, %p91_p3 }
  0x10   : > { %95 = sbr.rel (%p92_p4) target bundleno = 500 (0x1f4), region = 50 }
  0x15   : > { %s377_s18 = sand.u32 1, %s276_s9   ;;  %v114_v1 = vlaneseq  ;;  %v339_v11 = vmov -1.0   ;;  %s285_s22 = sshll.u32 %s329_s6, 2 }
  0x16   : > { %s282_s19 = sshll.u32 %s377_s18, 2  ;;  %s183_s25 = scalar_lea.vmem %s398_s1, %s285_s22 }
  0x17   : > { %s104_s20 = scalar_lea.vmem [#allocation1], %s282_s19  ;;  %v115_v3 = vand.u32 127, %v114_v1  ;;  %v118_v4 = vshrl.u32 %v114_v1, 7  ;;  %s108_s21 = scalar_lea.vmem [#allocation3], %s282_s19 }
  0x18   : > { %v112_v2 = vld [vmem:[%s104_s20] sm:$0xf] }
  0x19   : > { %113 = vst [vmem:[#allocation0] sm:$0xf] %v112_v2  ;;  %vm116_vm0 = vcmp.lt.s32.totalorder %v115_v3, 3  ;;  %vm125_vm1 = vcmp.ge.s32.totalorder %v118_v4, %v115_v3  ;;  %vm120_vm2 = vcmp.eq.s32.totalorder %v118_v4, %v115_v3  ;;  %vm139_vm4 = vcmp.eq.s32.totalorder %v115_v3, 0 }
  0x1a   : > { %vm126_vm3 = vmand %vm125_vm1, %vm116_vm0  ;;  %vm136_vm5 = vcmp.eq.s32.totalorder %v115_v3, %v118_v4  ;;  %v140_v12 = vsel %vm139_vm4, 1.0, %v339_v11  ;;  %vm147_vm6 = vcmp.eq.s32.totalorder %v115_v3, 1  ;;  %vm157_vm7 = vcmp.eq.s32.totalorder %v115_v3, 2 }
  0x1b   : > { %v141_v13 = vsel %vm136_vm5, %v140_v12, 0.0 }
  0x20   : > { %v121_v5 = vld [vmem:[#allocation0] sm:$0xff] }
  0x21   : > { %v122_v6 = vsel %vm120_vm2, %v121_v5, 0.0  ;;  %v127_v7 = vsel %vm126_vm3, %v121_v5, 0.0 }
  0x22   : > { %123 = vadd.xlane.f32.xlu0 %v122_v6 }
  0xab   : > { %v124_v8 = vpop.xlane.xlu0 %123 }
  0xac   : > { %313 = vrcp.f32 %v124_v8  ;;  %vm164_vm8 = vweird.f32 %v124_v8 }
  0xb9   : > { %v314_v9 = vpop.eup %313 }
  0xba   : > { %v129_v10 = vmul.f32 %v314_v9, %v127_v7 }
  0xbc   : > { %130 = vst [vmem:[#allocation4] sm:$0xff] %v129_v10 }
  0xc3   : > { %v143_v14 = vld [vmem:[#allocation4 + $0x1] ss:$0 sm:$0xff]  ;;  %v153_v17 = vld [vmem:[#allocation4 + $0x2] ss:$0 sm:$0xff] }
  0xc4   : > { %v144_v15 = vxor.u32 2147483648, %v143_v14  ;;  %v154_v19 = vxor.u32 2147483648, %v153_v17 }
  0xc6   : > { %v148_v16 = vmul.f32 %v144_v15, %v141_v13 }
  0xc8   : > { %149 = vadd.xlane.f32.xlu0 %v148_v16 }
 0x151   : > { %v150_v18 = vpop.xlane.xlu0 %149 }
 0x152   : > { %v151_v20 = vsel %vm147_vm6, %v150_v18, %v141_v13 }
 0x153   : > { %v158_v21 = vmul.f32 %v154_v19, %v151_v20 }
 0x155   : > { %159 = vadd.xlane.f32.xlu1 %v158_v21 }
 0x1de   : > { %v160_v22 = vpop.xlane.xlu1 %159 }
 0x1df   : > { %v161_v23 = vsel %vm157_vm7, %v160_v22, %v151_v20 }
 0x1e0   : > { %v163_v24 = vmul.f32 %v314_v9, %v161_v23 }
 0x1e2   : > { %v165_v25 = vsel %vm164_vm8, %v161_v23, %v163_v24 }
 0x1e3   : > { %166 = vst [vmem:[#allocation2] sm:$0xff] %v165_v25 }
 0x1ea   : > { %v171_v26 = vld [vmem:[#allocation2] sm:$0xf] }
 0x1eb   : > { %174 = vst [vmem:[%s108_s21] sm:$0xf] %v171_v26 }
 0x1f2   : > { %v200_v27 = vld [vmem:[%s108_s21] sm:$0xf] }
 0x1f3   : > { %201 = vst [vmem:[%s183_s25] sm:$0xf] %v200_v27 }
 0x1f4 PF: > { %s7_s8 = sadd.s32 1, %s337_s8   ;;  %s399_s6 = smov %s333_s7 }
 0x1f5   : > { %p4_p5 = scmp.ge.s32.totalorder %s7_s8, 4   ;;  %s400_s7 = smov %s402_s10 }
 0x1f7   :  { %6 = sbr.rel (!%p4_p5) target bundleno = 2 (0x2), region = 112 }

// kernel: custom-call.12
= control target key start
LH: loop header
LB: loop body
LE: loop exit
PB: predicated region body
PF: predicated region fallthrough
CT: control target
= control target key end

     0   :  { %s349_s6 = smov 0   ;;  %s351_s7 = smov 0   ;;  %s396_s0 = inlined_call_operand.vmem [shape: f32[2,1,3,3], index: 0, kind: input, shape index: {}]   ;;  %s397_s1 = inlined_call_operand.vmem [shape: f32[2,1,3,3], index: 1, kind: output, shape index: {}]  }
   0x1   :  { %s353_s8 = smov 0  }
   0x2 LB: > { %s275_s9 = sadd.s32 4294967295, %s336_s8   ;;  %s33_s10 = sadd.s32 1, %s332_s7  ;;  %s336_s8 = sphi %s353_s8, %s7_s8   ;;  %s332_s7 = sphi %s351_s7, %s399_s7   ;;  %s328_s6 = sphi %s349_s6, %s398_s6  }
   0x3   : > { %p35_p0 = scmp.ge.s32.totalorder %s33_s10, 2  ;;  %p277_p1 = scmp.ge.s32.totalorder %s336_s8, 2 }
   0x4   : > { %s49_s11 = sand.u32 (!%p277_p1), 1, %s336_s8   ;;  %s279_s12 = sshll.u32 (!%p277_p1), %s332_s7, 2 }
   0x5   : > { %s401_s10 = smov (%p35_p0, %s33_s10), 0  ;;  %47 = sbr.rel (%p277_p1) target bundleno = 12 (0xc), region = 16 }
   0x6   : > { %s278_s13 = sshll.u32 (!%p277_p1), %s49_s11, 2  ;;  %s56_s16 = scalar_lea.vmem (!%p277_p1), %s396_s0, %s279_s12 }
   0x7   : > { %s51_s17 = scalar_lea.vmem (!%p277_p1), [#allocation1], %s278_s13 }
   0xa   : > { %v73_v0 = vld [vmem:[%s56_s16] sm:$0xf] }
   0xb   : > { %74 = vst [vmem:[%s51_s17] sm:$0xf] %v73_v0 }
   0xc PF: > { %p280_p2 = scmp.ge.s32.totalorder %s336_s8, 1  ;;  %p91_p3 = scmp.lt.s32.totalorder %s336_s8, 3 }
   0xe   : > { %p92_p4 = pnand %p280_p2, %p91_p3 }
  0x10   : > { %95 = sbr.rel (%p92_p4) target bundleno = 500 (0x1f4), region = 50 }
  0x15   : > { %s376_s18 = sand.u32 1, %s275_s9   ;;  %v114_v1 = vlaneseq  ;;  %v338_v11 = vmov -1.0   ;;  %s284_s22 = sshll.u32 %s328_s6, 2 }
  0x16   : > { %s281_s19 = sshll.u32 %s376_s18, 2  ;;  %s182_s25 = scalar_lea.vmem %s397_s1, %s284_s22 }
  0x17   : > { %s104_s20 = scalar_lea.vmem [#allocation1], %s281_s19  ;;  %v115_v3 = vand.u32 127, %v114_v1  ;;  %v118_v4 = vshrl.u32 %v114_v1, 7  ;;  %s108_s21 = scalar_lea.vmem [#allocation3], %s281_s19 }
  0x18   : > { %v112_v2 = vld [vmem:[%s104_s20] sm:$0xf] }
  0x19   : > { %113 = vst [vmem:[#allocation0] sm:$0xf] %v112_v2  ;;  %vm116_vm0 = vcmp.lt.s32.totalorder %v115_v3, 3  ;;  %vm125_vm1 = vcmp.le.s32.totalorder %v118_v4, %v115_v3  ;;  %vm120_vm2 = vcmp.eq.s32.totalorder %v118_v4, %v115_v3  ;;  %vm139_vm4 = vcmp.eq.s32.totalorder %v115_v3, 2 }
  0x1a   : > { %vm126_vm3 = vmand %vm125_vm1, %vm116_vm0  ;;  %vm136_vm5 = vcmp.eq.s32.totalorder %v115_v3, %v118_v4  ;;  %v140_v12 = vsel %vm139_vm4, 1.0, %v338_v11  ;;  %vm147_vm6 = vcmp.eq.s32.totalorder %v115_v3, 1  ;;  %vm156_vm7 = vcmp.eq.s32.totalorder %v115_v3, 0 }
  0x1b   : > { %v141_v13 = vsel %vm136_vm5, %v140_v12, 0.0 }
  0x20   : > { %v121_v5 = vld [vmem:[#allocation0] sm:$0xff] }
  0x21   : > { %v122_v6 = vsel %vm120_vm2, %v121_v5, 0.0  ;;  %v127_v7 = vsel %vm126_vm3, %v121_v5, 0.0 }
  0x22   : > { %123 = vadd.xlane.f32.xlu0 %v122_v6 }
  0xab   : > { %v124_v8 = vpop.xlane.xlu0 %123 }
  0xac   : > { %312 = vrcp.f32 %v124_v8  ;;  %vm163_vm8 = vweird.f32 %v124_v8 }
  0xb9   : > { %v313_v9 = vpop.eup %312 }
  0xba   : > { %v129_v10 = vmul.f32 %v313_v9, %v127_v7 }
  0xbc   : > { %130 = vst [vmem:[#allocation4] sm:$0xff] %v129_v10 }
  0xc3   : > { %v143_v14 = vld [vmem:[#allocation4 + $0x1] ss:$0 sm:$0xff]  ;;  %v152_v17 = vld [vmem:[#allocation4] ss:$0 sm:$0xff] }
  0xc4   : > { %v144_v15 = vxor.u32 2147483648, %v143_v14  ;;  %v153_v19 = vxor.u32 2147483648, %v152_v17 }
  0xc6   : > { %v148_v16 = vmul.f32 %v144_v15, %v141_v13 }
  0xc8   : > { %149 = vadd.xlane.f32.xlu0 %v148_v16 }
 0x151   : > { %v150_v18 = vpop.xlane.xlu0 %149 }
 0x152   : > { %v151_v20 = vsel %vm147_vm6, %v150_v18, %v141_v13 }
 0x153   : > { %v157_v21 = vmul.f32 %v153_v19, %v151_v20 }
 0x155   : > { %158 = vadd.xlane.f32.xlu1 %v157_v21 }
 0x1de   : > { %v159_v22 = vpop.xlane.xlu1 %158 }
 0x1df   : > { %v160_v23 = vsel %vm156_vm7, %v159_v22, %v151_v20 }
 0x1e0   : > { %v162_v24 = vmul.f32 %v313_v9, %v160_v23 }
 0x1e2   : > { %v164_v25 = vsel %vm163_vm8, %v160_v23, %v162_v24 }
 0x1e3   : > { %165 = vst [vmem:[#allocation2] sm:$0xff] %v164_v25 }
 0x1ea   : > { %v170_v26 = vld [vmem:[#allocation2] sm:$0xf] }
 0x1eb   : > { %173 = vst [vmem:[%s108_s21] sm:$0xf] %v170_v26 }
 0x1f2   : > { %v199_v27 = vld [vmem:[%s108_s21] sm:$0xf] }
 0x1f3   : > { %200 = vst [vmem:[%s182_s25] sm:$0xf] %v199_v27 }
 0x1f4 PF: > { %s7_s8 = sadd.s32 1, %s336_s8   ;;  %s398_s6 = smov %s332_s7 }
 0x1f5   : > { %p4_p5 = scmp.ge.s32.totalorder %s7_s8, 4   ;;  %s399_s7 = smov %s401_s10 }
 0x1f7   :  { %6 = sbr.rel (!%p4_p5) target bundleno = 2 (0x2), region = 111 }

// kernel: augmentor_forward.6
= control target key start
LH: loop header
LB: loop body
LE: loop exit
PB: predicated region body
PF: predicated region fallthrough
CT: control target
= control target key end

     0   :  { %s1490_s0 = inlined_call_operand.vmem [shape: f32[30], index: 0, kind: input, shape index: {}]   ;;  %s1491_s1 = inlined_call_operand.vmem [shape: s32[2], index: 1, kind: input, shape index: {}]   ;;  %s1492_s2 = inlined_call_operand.vmem [shape: f32[2,16,16], index: 2, kind: input, shape index: {}, may-alias: {2,5}]   ;;  %s1493_s3 = inlined_call_operand.vmem [shape: bf16[2,16,16], index: 3, kind: input, shape index: {}]   ;;  %s1494_s4 = inlined_call_operand.vmem [shape: u8[2,16,16], index: 4, kind: input, shape index: {}, may-alias: {4,7}]   ;;  %s1495_s5 = inlined_call_operand.vmem [shape: f32[2,16,16], index: 5, kind: output, shape index: {0}, may-alias: {2,5}]   ;;  %s1496_s6 = inlined_call_operand.hbm [shape: f32[2,3,16,16], index: 6, kind: output, shape index: {1}]   ;;  %s1497_s7 = inlined_call_operand.vmem [shape: u8[2,16,16], index: 7, kind: output, shape index: {2}, may-alias: {4,7}]  }
   0x1   :  { %1504 = sst [smem:[#allocation13_spill]] %s1490_s0 }
   0x2   :  { %1505 = sst [smem:[#allocation14_spill]] %s1491_s1 }
   0x3   :  { %13 = vsyncpa [#allocation4], 0 }
   0x4   :  { %14 = vsyncpa [#allocation6], 0 }
   0x5   :  { %15 = vsyncpa [#allocation3], 0 }
   0x6   :  { %17 = vsyncpa [#allocation3 + $0x1], 0  ;;  %s1187_s24 = smov 0   ;;  %s1189_s25 = smov 0  }
   0x7   :  { %s1191_s26 = smov 0   ;;  %s1193_s27 = smov 0  }
   0x8   :  { %s1195_s28 = smov 0   ;;  %s1197_s29 = smov 0  }
   0x9 LB: > { %1506 = sst [smem:[#allocation11_spill]] %s1136_s28  ;;  %s905_s30 = sadd.s32 4294967295, %s1140_s29   ;;  %s1140_s29 = sphi %s1197_s29, %s23_s29   ;;  %s1136_s28 = sphi %s1195_s28, %s1528_s28   ;;  %s1132_s27 = sphi %s1193_s27, %s1527_s27   ;;  %s1128_s26 = sphi %s1191_s26, %s1531_s26   ;;  %s1124_s25 = sphi %s1189_s25, %s1530_s25   ;;  %s1120_s24 = sphi %s1187_s24, %s1529_s24  }
   0xa   : > { %s906_s8 = sadd.s32 4294967294, %s1140_s29   ;;  %s35_s9 = sadd.s32 1, %s1136_s28 }
   0xb   : > { %s198_s10 = sadd.s32 1, %s1128_s26  ;;  %p37_p0 = scmp.ge.s32.totalorder %s35_s9, 2 }
   0xc   : > { %p208_p1 = scmp.ne.s32.totalorder %s1128_s26, %s1124_s25  ;;  %p209_p2 = scmp.eq.s32.totalorder %s905_s30, 1 }
   0xd   : > { %p214_p3 = scmp.ne.s32.totalorder %s1124_s25, %s1120_s24  ;;  %s1533_s9 = smov (%p37_p0, %s35_s9), 0 }
   0xe   : > { %1507 = sst [smem:[#allocation12_spill]] %s1533_s9  ;;  %p1227_p4 = por %p209_p2, %p208_p1 }
   0xf   : > { %p215_p5 = scmp.eq.s32.totalorder %s906_s8, 1  ;;  %s193_s12 = ssub.s32 %s1136_s28, %s1533_s9 }
  0x10   : > { %s1508_s11 = scalar_select %p1227_p4, 1, 0 }
  0x11   : > { %p907_p6 = scmp.ge.s32.totalorder %s1140_s29, 1  ;;  %p196_p7 = scmp.eq.s32.totalorder %s193_s12, 0 }
  0x12   : > { %p1234_p8 = por %p215_p5, %p214_p3  ;;  %p250_p9 = scmp.lt.s32.totalorder %s1140_s29, 3 }
  0x13   : > { %s1240_s14 = scalar_select %p196_p7, %s1128_s26, %s198_s10  }
  0x14   : > { %s1509_s13 = scalar_select %p1234_p8, 1, 0 }
  0x15   : > { %p1242_p10 = pnand %p907_p6, %p250_p9  ;;  %p1246_p11 = scmp.eq.s32.totalorder %s905_s30, 0 }
  0x16   : > { %s1512_s0 = sld [smem:[#allocation13_spill]] }
  0x17   : > { %s1510_s15 = scalar_select %p1242_p10, 1, 0 }
  0x18   : > { %s1511_s16 = scalar_select %p1246_p11, 1, 0 }
  0x19   : > { %p958_p12 = pneg %p1242_p10  ;;  %s1513_s1 = sld [smem:[#allocation14_spill]] }
  0x1b   : > { %p1260_p13 = pnand %p1246_p11, %p958_p12 }
  0x1c   : > { %s263_s19 = sshll.u32 %s1512_s0, 4  ;;  %s264_s19 = int_to_ptr.vmem [resolvable:$true] %s263_s19 }
  0x1d   : > { %s1026_s30 = scalar_lea.vmem %s264_s19, 16  ;;  %p1028_p1 = pneg %p1260_p13 }
  0x1e   : > { %p1027_p0 = scmp.ne.s32.totalorder %s264_s19, %s1026_s30  ;;  %p1034_p5 = scmp.lt.s32.totalorder %s264_s19, %s264_s19 }
  0x1f   : > { %s274_s22 = sshll.u32 %s1513_s1, 4  ;;  %p1035_p6 = scmp.lt.s32.totalorder %s1026_s30, %s1026_s30  ;;  %s275_s22 = int_to_ptr.vmem [resolvable:$true] %s274_s22 }
  0x20   : > { %p1029_p2 = pnand %p1028_p1, %p1027_p0 }
  0x21   : > { %p1036_p7 = por %p1035_p6, %p1034_p5 }
  0x22   : > { %p1030_p3 = pneg %p1029_p2 }
  0x24   : > { %p1037_p9 = pnand %p1036_p7, %p1030_p3 }
  0x26   : > { %1040 = shalt.err (!%p1037_p9)
}
  0x27   : > { %s1142_s8 = smov [#allocation2]   ;;  %s1041_s10 = scalar_lea.vmem %s275_s22, 16 }
  0x28   : > { %961 = dma.vmem_to_smem (!%p1260_p13), %s264_s19, 16, %s1142_s8, [#allocation4]  }
  0x29   : > { %p1042_p12 = scmp.ne.s32.totalorder %s275_s22, %s1041_s10  ;;  %p1049_p11 = scmp.lt.s32.totalorder %s275_s22, %s275_s22 }
  0x2a   : > { %p1050_p10 = scmp.lt.s32.totalorder %s1041_s10, %s1041_s10 }
  0x2b   : > { %p1044_p8 = pnand %p1042_p12, %p1028_p1 }
  0x2c   : > { %p1051_p0 = por %p1050_p10, %p1049_p11 }
  0x2d   : > { %p1045_p4 = pneg %p1044_p8 }
  0x2f   : > { %p1052_p2 = pnand %p1051_p0, %p1045_p4 }
  0x31   : > { %1055 = shalt.err (!%p1052_p2)
}
  0x32   : > { %s1143_s12 = smov [#allocation5]   ;;  %p1515_p3 = scmp.ne.s32.totalorder %s1510_s15, 0 }
  0x33   : > { %964 = dma.vmem_to_smem (!%p1260_p13), %s275_s22, 16, %s1143_s12, [#allocation6]  }
  0x34   : > { %326 = sbr.rel (%p1515_p3) target bundleno = 127 (0x7f), region = 40  ;;  %p1516_p5 = scmp.ne.s32.totalorder (!%p1515_p3), %s1511_s16, 0 }
  0x39   : > { %1107 = dma.done.wait (%p1516_p5), [#allocation4], 16  }
  0x3a   : > { %1109 = vsyncadd (%p1516_p5), [#allocation4], 4294967280 }
  0x3b   : > { %1111 = dma.done.wait (%p1516_p5), [#allocation6], 16  }
  0x3c   : > { %1113 = vsyncadd (%p1516_p5), [#allocation6], 4294967280 }
  0x3d   : > { %336 = sfence }
  0x3e   : > { %v456_v0 = vlaneseq  ;;  %s455_s15 = sld [smem:[#allocation5 + %s1132_s27]]  ;;  %p404_p4 = scmp.lt.s32.totalorder %s1132_s27, 1  ;;  %vm649_vm0 = vcmask 123904   ;;  %vm538_vm6 = vcmask 130048  }
  0x3f   : > { %s1283_s17 = smul.u32 15, %s1132_s27  ;;  %p1525_p11 = scmp.ne.s32.totalorder %s1508_s11, 0 }
  0x40   : > { %v457_v1 = vand.u32 127, %v456_v0  ;;  %v459_v2 = vshrl.u32 %v456_v0, 7  ;;  %s1286_s19 = scalar_select %p404_p4, %s1132_s27, 1 }
  0x41   : > { %s547_s20 = sadd.s32 1, %s1283_s17  ;;  %s1290_s21 = sld [smem:[#allocation2 + %s1283_s17]] }
  0x42   : > { %v465_v3 = vmul.u32 16, %v459_v2  ;;  %v460_v4 = vadd.s32 8, %v459_v2  ;;  %s559_s22 = sadd.s32 3, %s1283_s17  ;;  %s563_s23 = sadd.s32 4, %s1283_s17  ;;  %v541_v32 = vcvt.s32.f32 %v457_v1  ;;  %v1308_v33 = vcvt.s32.f32 %v459_v2 }
  0x43   : > { %s1294_s30 = sld [smem:[#allocation2 + %s547_s20]]  ;;  %s531_s8 = sadd.s32 12, %s1283_s17 }
  0x44   : > { %v467_v5 = vadd.s32 %v465_v3, %v457_v1  ;;  %v466_v6 = vmul.u32 16, %v460_v4  ;;  %s471_s16 = sxor.u32 320440878, %s455_s15  ;;  %s497_s18 = sxor.u32 57701188, %s455_s15  ;;  %v543_v40 = vcvt.s32.f32 %v460_v4 }
  0x45   : > { %v472_v8 = vstv %s471_s16  ;;  %v498_v9 = vstv %s497_s18  ;;  %s1297_s10 = sld [smem:[#allocation2 + %s559_s22]]  ;;  %s554_s15 = sadd.s32 2, %s1283_s17 }
  0x46   : > { %v469_v7 = vmul.u32 2654435761, %v467_v5  ;;  %v468_v10 = vadd.s32 %v466_v6, %v457_v1  ;;  %s1299_s12 = sld [smem:[#allocation2 + %s563_s23]]  ;;  %s575_s18 = sadd.s32 6, %s1283_s17 }
  0x47   : > { %s1302_s16 = sld [smem:[#allocation2 + %s531_s8]]  ;;  %s579_s20 = sadd.s32 7, %s1283_s17  ;;  %v545_v34 = vstv %s1290_s21 }
  0x48   : > { %v473_v11 = vadd.s32 %v472_v8, %v469_v7  ;;  %v499_v12 = vadd.s32 %v498_v9, %v469_v7  ;;  %v470_v13 = vmul.u32 2654435761, %v468_v10  ;;  %s1306_s0 = sld [smem:[#allocation2 + %s554_s15]]  ;;  %s934_s8 = sshll.u32 %s1286_s19, 3  ;;  %v1322_v47 = vmul.f32 %v545_v34, %v541_v32 }
  0x49   : > { %s1310_s22 = sld [smem:[#allocation2 + %s575_s18]]  ;;  %v549_v35 = vstv %s1294_s30  ;;  %s624_s18 = sadd.s32 13, %s1283_s17 }
  0x4a   : > { %v475_v14 = vshrl.u32 %v473_v11, 15  ;;  %v501_v15 = vshrl.u32 %v499_v12, 15  ;;  %v474_v16 = vadd.s32 %v472_v8, %v470_v13  ;;  %v500_v17 = vadd.s32 %v498_v9, %v470_v13  ;;  %s1314_s23 = sld [smem:[#allocation2 + %s579_s20]]  ;;  %s629_s1 = sadd.s32 14, %s1283_s17 }
  0x4b   : > { %v561_v43 = vstv %s1297_s10  ;;  %v550_v48 = vmul.f32 %v549_v35, %v1308_v33  ;;  %s421_s20 = scalar_lea.vmem %s1493_s3, %s934_s8  ;;  %s1328_s15 = sld [smem:[#allocation2 + %s624_s18]]  ;;  %v551_v59 = vmul.f32 %v549_v35, %v543_v40 }
  0x4c   : > { %v477_v18 = vxor.u32 %v475_v14, %v473_v11  ;;  %v503_v19 = vxor.u32 %v501_v15, %v499_v12  ;;  %v476_v20 = vshrl.u32 %v474_v16, 15  ;;  %v502_v21 = vshrl.u32 %v500_v17, 15  ;;  %s570_s10 = sadd.s32 5, %s1283_s17  ;;  %s586_s9 = sadd.s32 8, %s1283_s17  ;;  %v939_v60 = vld [vmem:[%s421_s20] sm:$0xff]  }
  0x4d   : > { %v565_v44 = vstv %s1299_s12  ;;  %v533_v49 = vstv %s1302_s16  ;;  %s1332_s12 = sld [smem:[#allocation2 + %s629_s1]]  ;;  %v1334_v54 = vmul.f32 %v561_v43, %v541_v32  ;;  %s1517_s28 = sshll.u32 %s1286_s19, 2  ;;  %v552_v63 = vadd.f32 %v550_v48, %v1322_v47 }
  0x4e   : > { %v479_v22 = vmul.u32 2246822507, %v477_v18  ;;  %v505_v23 = vmul.u32 2246822507, %v503_v19  ;;  %v478_v24 = vxor.u32 %v476_v20, %v474_v16  ;;  %v504_v25 = vxor.u32 %v502_v21, %v500_v17  ;;  %s431_s18 = scalar_lea.vmem %s1494_s4, %s1517_s28  ;;  %s1345_s1 = sld [smem:[#allocation2 + %s570_s10]] }
  0x4f   : > { %v566_v55 = vmul.f32 %v565_v44, %v1308_v33  ;;  %v556_v56 = vstv %s1306_s0  ;;  %v577_v0 = vstv %s1310_s22  ;;  %s593_s30 = sadd.s32 9, %s1283_s17  ;;  %v567_v3 = vmul.f32 %v565_v44, %v543_v40  ;;  %s1350_s28 = sld [smem:[#allocation2 + %s586_s9]]  ;;  %v943_v5 = vld [vmem:[%s431_s18] sm:$0xf]  }
  0x50   : > { %v481_v26 = vshrl.u32 %v479_v22, 13  ;;  %v507_v27 = vshrl.u32 %v505_v23, 13  ;;  %v480_v28 = vmul.u32 2246822507, %v478_v24  ;;  %v506_v29 = vmul.u32 2246822507, %v504_v25 }
  0x51   : > { %v581_v4 = vstv %s1314_s23  ;;  %s933_s20 = sshll.u32 %s1286_s19, 4  ;;  %v568_v8 = vadd.f32 %v566_v55, %v1334_v54  ;;  %v940_v9 = vunpack.c.l.bf16 %v939_v60  ;;  %s602_s22 = sadd.s32 10, %s1283_s17  ;;  %v578_v12 = vmul.f32 %v577_v0, %v541_v32 }
  0x52   : > { %v483_v30 = vxor.u32 %v481_v26, %v479_v22  ;;  %v509_v31 = vxor.u32 %v507_v27, %v505_v23  ;;  %v482_v36 = vshrl.u32 %v480_v28, 13  ;;  %v508_v37 = vshrl.u32 %v506_v29, 13  ;;  %s1357_s23 = sld [smem:[#allocation2 + %s593_s30]]  ;;  %s612_s9 = sadd.s32 11, %s1283_s17 }
  0x53   : > { %v626_v13 = vstv %s1328_s15  ;;  %p631_p8 = scmp.gt.f32.partialorder %s1332_s12, 0.5  ;;  %v582_v16 = vmul.f32 %v581_v4, %v1308_v33  ;;  %v944_v17 = vunpack.c.0.s8 %v943_v5  ;;  %v583_v20 = vmul.f32 %v581_v4, %v543_v40  ;;  %s1361_s21 = sld [smem:[#allocation2 + %s602_s22]] }
  0x54   : > { %v485_v38 = vmul.u32 3266489909, %v483_v30  ;;  %v511_v39 = vmul.u32 3266489909, %v509_v31  ;;  %v484_v41 = vxor.u32 %v482_v36, %v480_v28  ;;  %v510_v42 = vxor.u32 %v508_v37, %v506_v29  ;;  %s389_s17 = sand.u32 1, %s1124_s25   ;;  %s1368_s15 = sld [smem:[#allocation2 + %s612_s9]] }
  0x55   : > { %s632_s10 = scalar_select %p631_p8, 1, 0  ;;  %v945_v21 = vunpack.c.1.s8 %v943_v5  ;;  %vm1363_vm1 = vcmp.gt.f32.partialorder %v940_v9, %v626_v13  ;;  %v641_v24 = vand.u32 255, %v944_v17  ;;  %v941_v25 = vunpack.c.h.bf16 %v939_v60 }
  0x56   : > { %v487_v45 = vshrl.u32 %v485_v38, 16  ;;  %v513_v46 = vshrl.u32 %v511_v39, 16  ;;  %v486_v50 = vmul.u32 3266489909, %v484_v41  ;;  %v512_v51 = vmul.u32 3266489909, %v510_v42  ;;  %s1375_s18 = scalar_lea.vmem %s1492_s2, %s933_s20  ;;  %s441_s8 = scalar_lea.vmem %s1495_s5, %s933_s20 }
  0x57   : > { %v633_v28 = vstv %s632_s10  ;;  %v642_v29 = vand.u32 255, %v945_v21  ;;  %v584_v31 = vadd.f32 %v582_v16, %v578_v12  ;;  %vm1381_vm3 = vcmp.gt.f32.partialorder %v941_v25, %v626_v13  ;;  %s1394_s30 = smul.u32 48, %s389_s17  ;;  %v529_v42 = vld [vmem:[%s1375_s18] sm:$0xff] }
  0x58   : > { %v489_v52 = vxor.u32 %v487_v45, %v485_v38  ;;  %v515_v53 = vxor.u32 %v513_v46, %v511_v39  ;;  %v488_v57 = vshrl.u32 %v486_v50, 16  ;;  %v514_v58 = vshrl.u32 %v512_v51, 16  ;;  %s947_s20 = smul.u32 768, %s1132_s27 }
  0x59   : > { %vm1377_vm2 = vcmp.eq.s32.totalorder %v633_v28, 1  ;;  %v553_v35 = vadd.f32 %v551_v59, %v1322_v47  ;;  %v572_v36 = vstv %s1345_s1  ;;  %v588_v37 = vstv %s1350_s28  ;;  %s1524_s1 = sshll.u32 %s1286_s19, 2  ;;  %s391_s19 = scalar_lea.vmem [#allocation7], %s1394_s30 }
  0x5a   : > { %v491_v61 = vshrl.u32 %v489_v52, 8  ;;  %v517_v62 = vshrl.u32 %v515_v53, 8  ;;  %v490_v1 = vxor.u32 %v488_v57, %v486_v50  ;;  %v516_v2 = vxor.u32 %v514_v58, %v512_v51  ;;  %vm635_vm4 = vmand %vm1363_vm1, %vm1377_vm2  ;;  %s452_s9 = scalar_lea.vmem %s1497_s7, %s1524_s1  ;;  %v530_v57 = vld [vmem:[%s1375_s18 + $0x8] sm:$0xff]  ;;  %s690_s0 = sshll.u32 %s391_s19, 4  ;;  %s1431_s0 = int_to_ptr.vmem [resolvable:$true] %s690_s0 }
  0x5b   : > { %v557_v39 = vadd.f32 %v556_v56, %v552_v63  ;;  %v569_v40 = vadd.f32 %v567_v3, %v1334_v54  ;;  %v643_v41 = vsel %vm635_vm4, 0, %v641_v24  ;;  %vm636_vm5 = vmand %vm1381_vm3, %vm1377_vm2  ;;  %v585_v44 = vadd.f32 %v583_v20, %v578_v12  ;;  %s1144_s18 = smov [#allocation7]  }
  0x5c   : > { %v493_v6 = vcvt.s32.f32 %v491_v61  ;;  %v519_v7 = vcvt.s32.f32 %v517_v62  ;;  %v492_v10 = vshrl.u32 %v490_v1, 8  ;;  %v518_v11 = vshrl.u32 %v516_v2, 8  ;;  %s1060_s30 = sshll.u32 %s1144_s18, 4  ;;  %s1061_s30 = int_to_ptr.vmem [resolvable:$false] %s1060_s30 }
  0x5d   : > { %v645_v45 = vpack.c.b16 %v643_v41, %v643_v41  ;;  %v644_v46 = vsel %vm636_vm5, 0, %v642_v29  ;;  %v573_v48 = vadd.f32 %v572_v36, %v568_v8  ;;  %v589_v50 = vadd.f32 %v588_v37, %v584_v31  ;;  %s1062_s1 = scalar_lea.vmem %s1061_s30, 1536  ;;  %p1063_p6 = scmp.lt.s32.totalorder %s1431_s0, %s1061_s30 }
  0x5e   : > { %v495_v14 = vmul.f32 5.9604645e-08, %v493_v6  ;;  %v521_v15 = vmul.f32 5.9604645e-08, %v519_v7  ;;  %v494_v18 = vcvt.s32.f32 %v492_v10  ;;  %v520_v19 = vcvt.s32.f32 %v518_v11 }
  0x5f   : > { %v647_v51 = vpack.c.b16 %v644_v46, %v644_v46  ;;  %v595_v52 = vstv %s1357_s23  ;;  %v646_v54 = vpack.c.b8 %v645_v45, %v645_v45  ;;  %v558_v58 = vadd.f32 %v556_v56, %v553_v35  ;;  %s1438_s23 = scalar_lea.hbm %s1496_s6, %s947_s20 }
  0x60   : > { %v523_v22 = vadd.f32 %v521_v15, %v495_v14  ;;  %v496_v26 = vmul.f32 5.9604645e-08, %v494_v18  ;;  %v522_v27 = vmul.f32 5.9604645e-08, %v520_v19  ;;  %v604_v59 = vstv %s1361_s21  ;;  %s1445_s21 = scalar_lea.sflag [#allocation3], %s389_s17 }
  0x61   : > { %v648_v60 = vpack.c.b8 %v647_v51, %v647_v51  ;;  %v574_v62 = vadd.f32 %v572_v36, %v569_v40  ;;  %v614_v63 = vstv %s1368_s15  ;;  %v590_v0 = vadd.f32 %v588_v37, %v585_v44  ;;  %650 = vst.msk [vmem:[%s452_s9] sm:$0x3] %vm649_vm0, %v646_v54  ;;  %s1056_s15 = scalar_lea.vmem %s1431_s0, 768 }
  0x62   : > { %v924_v30 = vadd.f32 -1.0, %v523_v22  ;;  %v524_v34 = vadd.f32 %v522_v27, %v496_v26  ;;  %p1057_p10 = scmp.ne.s32.totalorder %s1431_s0, %s1056_s15  ;;  %p1064_p7 = scmp.lt.s32.totalorder %s1062_s1, %s1056_s15 }
  0x63   : > { %651 = vst.msk [vmem:[%s452_s9 + $0x2] sm:$0x3] %vm649_vm0, %v648_v60 }
  0x64   : > { %v527_v38 = vmul.f32 2.4494896, %v924_v30  ;;  %v925_v43 = vadd.f32 -1.0, %v524_v34  ;;  %p1058_p13 = pnand %p1057_p10, %p1525_p11  ;;  %p1065_p9 = por %p1064_p7, %p1063_p6 }
  0x66   : > { %v534_v47 = vmul.f32 %v533_v49, %v527_v38  ;;  %v528_v53 = vmul.f32 2.4494896, %v925_v43  ;;  %p1059_p1 = pneg %p1058_p13 }
  0x68   : > { %v536_v55 = vadd.f32 %v534_v47, %v529_v42  ;;  %v535_v61 = vmul.f32 %v533_v49, %v528_v53  ;;  %p1066_p12 = pnand %p1065_p9, %p1059_p1 }
  0x6a   : > { %v591_v1 = vmul.f32 %v557_v39, %v536_v55  ;;  %v600_v2 = vmul.f32 %v573_v48, %v536_v55  ;;  %v610_v3 = vmul.f32 %v589_v50, %v536_v55  ;;  %539 = vst.msk [vmem:[%s441_s8] sm:$0xff] %vm538_vm6, %v536_v55  ;;  %v537_v56 = vadd.f32 %v535_v61, %v530_v57 }
  0x6c   : > { %v596_v4 = vadd.f32 %v595_v52, %v591_v1  ;;  %v605_v5 = vadd.f32 %v604_v59, %v600_v2  ;;  %v615_v6 = vadd.f32 %v614_v63, %v610_v3  ;;  %v592_v49 = vmul.f32 %v558_v58, %v537_v56  ;;  %540 = vst.msk [vmem:[%s441_s8 + $0x8] sm:$0xff] %vm538_vm6, %v537_v56 }
  0x6d   : > { %v601_v7 = vmul.f32 %v574_v62, %v537_v56  ;;  %v611_v8 = vmul.f32 %v590_v0, %v537_v56 }
  0x6e   : > { %598 = vst.msk [vmem:[%s391_s19] sm:$0xff] %vm538_vm6, %v596_v4  ;;  %926 = vst.msk [vmem:[%s391_s19 + $0x10] sm:$0xff] %vm538_vm6, %v605_v5  ;;  %v597_v9 = vadd.f32 %v595_v52, %v592_v49 }
  0x6f   : > { %928 = vst.msk [vmem:[%s391_s19 + $0x20] sm:$0xff] %vm538_vm6, %v615_v6  ;;  %v606_v10 = vadd.f32 %v604_v59, %v601_v7  ;;  %v616_v11 = vadd.f32 %v614_v63, %v611_v8 }
  0x70   : > { %599 = vst.msk [vmem:[%s391_s19 + $0x8] sm:$0xff] %vm538_vm6, %v597_v9 }
  0x71   : > { %927 = vst.msk [vmem:[%s391_s19 + $0x18] sm:$0xff] %vm538_vm6, %v606_v10  ;;  %929 = vst.msk [vmem:[%s391_s19 + $0x28] sm:$0xff] %vm538_vm6, %v616_v11 }
  0x72   : > { %1069 = shalt.err (!%p1066_p12)
}
  0x73   : > { %s1070_s17 = scalar_lea.hbm %s1438_s23, 768  ;;  %s1074_s9 = scalar_lea.hbm %s1496_s6, 1536 }
  0x74   : > { %p1071_p0 = scmp.ne.s32.totalorder %s1438_s23, %s1070_s17  ;;  %p1075_p5 = scmp.lt.s32.totalorder %s1438_s23, %s1496_s6 }
  0x75   : > { %p1076_p4 = scmp.lt.s32.totalorder %s1074_s9, %s1070_s17 }
  0x76   : > { %p1072_p2 = pnand %p1071_p0, %p1525_p11 }
  0x77   : > { %p1077_p8 = por %p1076_p4, %p1075_p5 }
  0x78   : > { %p1073_p3 = pneg %p1072_p2 }
  0x7a   : > { %p1078_p10 = pnand %p1077_p8, %p1073_p3 }
  0x7c   : > { %1081 = shalt.err (!%p1078_p10)
}
  0x7d   : > { %s1145_s8 = smov 128   ;;  %s1146_s19 = smov 8  }
  0x7e   : > { %956 = dma.vmem_to_hbm [thread:$0]  (%p1525_p11), %s1431_s0, 768, %s1438_s23, %s1445_s21, %s1145_s8, %s1145_s8, %s1146_s19  }
  0x7f PF: > { %p973_p13 = scmp.ge.s32.totalorder %s1140_s29, 2  ;;  %s721_s20 = sand.u32 1, %s1120_s24  }
  0x80   : > { %p1526_p1 = scmp.ne.s32.totalorder %s1509_s13, 0  ;;  %s722_s27 = scalar_lea.sflag [#allocation3], %s721_s20 }
  0x82   : > { %p966_p6 = pnand %p973_p13, %p1526_p1 }
  0x84   : > { %p967_p7 = pneg %p966_p6 }
  0x86   : > { %1115 = dma.done.wait (%p967_p7), %s722_s27, 768  }
  0x87   : > { %1117 = vsyncadd (%p967_p7), %s722_s27, 4294966528  ;;  %s23_s29 = sadd.s32 1, %s1140_s29   ;;  %s1527_s27 = sld [smem:[#allocation11_spill]] }
  0x88   : > { %p20_p9 = scmp.ge.s32.totalorder %s23_s29, 4   ;;  %s1528_s28 = sld [smem:[#allocation12_spill]] }
  0x89   : > { %s1529_s24 = smov %s1124_s25  ;;  %s1530_s25 = smov %s1128_s26 }
  0x8a   : > { %s1531_s26 = smov %s1240_s14  ;;  %22 = sbr.rel (!%p20_p9) target bundleno = 9 (0x9), region = 116 }
  0x8f   :  { %739 = vsyncpa [#allocation3], 1 }
  0x90   :  { %741 = vsyncpa [#allocation3 + $0x1], 1 }
  0x91   :  { %742 = vsyncpa [#allocation4], 1 }
  0x92   :  { %744 = vsyncpa [#allocation4 + $0x1], 1 }
  0x93   :  { %745 = vsyncpa [#allocation6], 1 }

</bundles_post_ra>
